<compile_context>
chip_gen: v7x
topology: tpu7x:2x2x1
jax: 0.10.0
libtpu: 0.0.40
codegen_flags: <defaults>
</compile_context>

<pallas_src>
import functools
import math

import jax
import jax.numpy as jnp
from jax.experimental import pallas as pl
from jax.experimental.pallas import tpu as pltpu


def _layernorm(z, g, b):
    mu = jnp.mean(z, axis=-1, keepdims=True)
    var = jnp.mean((z - mu) ** 2, axis=-1, keepdims=True)
    return (z - mu) * jax.lax.rsqrt(var + 1e-5) * g + b


def fused_transformer_kernel(
    x_ref, bias_ref,
    wqkv_ref, wo_ref, bo_ref,
    g1_ref, b1_ref,
    wf1_ref, bf1_ref, wf2_ref, bf2_ref,
    g2_ref, b2_ref,
    out_ref,
    *, heads, head_dim):
    """Grid = (batch, layer). out_ref (same block across the layer axis) is the
    VMEM-resident activation; one grid step == one encoder layer for one batch."""
    layer = pl.program_id(1)
    H, Dh = heads, head_dim
    S = out_ref.shape[1]
    E = H * Dh

    # Layer 0: seed the resident activation with this batch's input block.
    @pl.when(layer == 0)
    def _():
        out_ref[...] = x_ref[...]

    h = out_ref[0]                                           # [S, E] f32

    # ---- fused lane-dense QKV projection (softmax scale folded into Q block)
    qkv = jnp.dot(h.astype(jnp.bfloat16), wqkv_ref[0],
                  preferred_element_type=jnp.float32)        # [S, 3E]
    qkv = qkv.astype(jnp.bfloat16)

    def to_heads(t):                                         # [S, E] -> [H, S, Dh]
        return jnp.transpose(t.reshape(S, H, Dh), (1, 0, 2))

    qh = to_heads(qkv[:, :E])
    kh = to_heads(qkv[:, E:2 * E])
    vh = to_heads(qkv[:, 2 * E:])

    # ---- attention: per-batch scores + additive mask bias -------------------
    scores = jnp.einsum("hqd,hkd->hqk", qh, kh,
                        preferred_element_type=jnp.float32)  # [H, S, S]
    scores = scores + bias_ref[0][None, :, :]

    m = jnp.max(scores, axis=-1, keepdims=True)
    p = jnp.exp(scores - m)
    denom = jnp.sum(p, axis=-1, keepdims=True)
    attn = (p * pl.reciprocal(denom, approx=True)).astype(jnp.bfloat16)

    ctx = jnp.einsum("hqk,hkd->hqd", attn, vh,
                     preferred_element_type=jnp.float32)     # [H, S, Dh]
    ctx = jnp.transpose(ctx, (1, 0, 2)).reshape(S, E)        # merge heads

    ao = jnp.dot(ctx.astype(jnp.bfloat16), wo_ref[0],
                 preferred_element_type=jnp.float32) + bo_ref[0]
    h1 = _layernorm(ao + h, g1_ref[0], b1_ref[0])

    # ---- feed-forward --------------------------------------------------------
    f1 = jnp.dot(h1.astype(jnp.bfloat16), wf1_ref[0],
                 preferred_element_type=jnp.float32) + bf1_ref[0]
    f1 = jnp.maximum(f1, 0.0)
    f2 = jnp.dot(f1.astype(jnp.bfloat16), wf2_ref[0],
                 preferred_element_type=jnp.float32) + bf2_ref[0]
    h_new = _layernorm(f2 + h1, g2_ref[0], b2_ref[0])

    out_ref[0] = h_new


def my_transformer(x, mask, layer_params, *, heads):
    """x: [B, S, E] f32, mask: [B, S, S] (1 = attend, 0 = masked)."""
    B, S, E = x.shape
    H = heads
    Dh = E // H
    L = len(layer_params)
    F = layer_params[0]["wf1"].shape[0]

    bf16, f32 = jnp.bfloat16, jnp.float32
    stack = lambda name: jnp.stack([p[name] for p in layer_params])

    # Block-diagonal fused QKV weight: Q/K/V become one lane-dense
    # [S,E] @ [E,3E] MXU matmul. 1/sqrt(E) is folded into the Q block.
    eye = jnp.eye(H, dtype=f32)
    scale = jnp.float32(1.0 / math.sqrt(E))

    def qkv_block(p):
        wq = jnp.kron(eye, p["wq"].T.astype(f32)) * scale
        wk = jnp.kron(eye, p["wk"].T.astype(f32))
        wv = jnp.kron(eye, p["wv"].T.astype(f32))
        return jnp.concatenate([wq, wk, wv], axis=1)                 # [E, 3E]

    wqkv = jnp.stack([qkv_block(p) for p in layer_params]).astype(bf16)  # [L,E,3E]
    wo = jnp.transpose(stack("wo"), (0, 2, 1)).astype(bf16)              # [L,E,E]
    bo = stack("bo")[:, None, :].astype(f32)                             # [L,1,E]
    g1 = stack("g1")[:, None, :].astype(f32)
    b1 = stack("b1")[:, None, :].astype(f32)
    wf1 = jnp.transpose(stack("wf1"), (0, 2, 1)).astype(bf16)            # [L,E,F]
    bf1 = stack("bf1")[:, None, :].astype(f32)                           # [L,1,F]
    wf2 = jnp.transpose(stack("wf2"), (0, 2, 1)).astype(bf16)            # [L,F,E]
    bf2 = stack("bf2")[:, None, :].astype(f32)
    g2 = stack("g2")[:, None, :].astype(f32)
    b2 = stack("b2")[:, None, :].astype(f32)

    # Additive mask bias (0 = attend, -1e20 = masked), per batch.
    bias = jnp.where(mask == 0, jnp.float32(-1e20), jnp.float32(0.0))    # [B,S,S]

    def wspec(*shape):
        return pl.BlockSpec((1,) + shape, lambda b, l: (l,) + (0,) * len(shape))

    act_spec = pl.BlockSpec((1, S, E), lambda b, l: (b, 0, 0))

    kernel = functools.partial(fused_transformer_kernel, heads=H, head_dim=Dh)

    out = pl.pallas_call(
        kernel,
        out_shape=jax.ShapeDtypeStruct((B, S, E), f32),
        grid=(B, L),
        in_specs=[
            act_spec,                                         # x
            pl.BlockSpec((1, S, S), lambda b, l: (b, 0, 0)),  # additive mask bias
            wspec(E, 3 * E),                                  # fused wqkv
            wspec(E, E), wspec(1, E),                         # wo, bo
            wspec(1, E), wspec(1, E),                         # ln1 gamma, beta
            wspec(E, F), wspec(1, F),                         # wf1, bf1
            wspec(F, E), wspec(1, E),                         # wf2, bf2
            wspec(1, E), wspec(1, E),                         # ln2 gamma, beta
        ],
        out_specs=act_spec,
        compiler_params=pltpu.CompilerParams(
            dimension_semantics=("parallel", "arbitrary"),
            vmem_limit_bytes=32 * 1024 * 1024),
    )(x.astype(f32), bias,
      wqkv, wo, bo,
      g1, b1,
      wf1, bf1, wf2, bf2,
      g2, b2)

    return out


def init_layer_params(key, hid_dim, heads, forward_expansion=4):
    Dh = hid_dim // heads
    F = forward_expansion * hid_dim
    ks = jax.random.split(key, 9)
    rnd = lambda k, shape: jax.random.normal(k, shape, jnp.float32) * 0.05
    return {
        # PyTorch [out, in] convention for all Linear weights.
        "wq": rnd(ks[0], (Dh, Dh)),
        "wk": rnd(ks[1], (Dh, Dh)),
        "wv": rnd(ks[2], (Dh, Dh)),
        "wo": rnd(ks[3], (hid_dim, hid_dim)),
        "bo": rnd(ks[4], (hid_dim,)),
        "g1": jnp.ones((hid_dim,), jnp.float32),
        "b1": jnp.zeros((hid_dim,), jnp.float32),
        "wf1": rnd(ks[5], (F, hid_dim)),
        "bf1": rnd(ks[6], (F,)),
        "wf2": rnd(ks[7], (hid_dim, F)),
        "bf2": rnd(ks[8], (hid_dim,)),
        "g2": jnp.ones((hid_dim,), jnp.float32),
        "b2": jnp.zeros((hid_dim,), jnp.float32),
    }


def my_transformer_ref(x, mask, layer_params, *, heads):
    """Pure-JAX f32 reference mirroring the PyTorch forward (eval mode)."""
    B, S, E = x.shape
    Dh = E // heads

    def ln(z, g, b):
        mu = jnp.mean(z, -1, keepdims=True)
        var = jnp.mean((z - mu) ** 2, -1, keepdims=True)
        return (z - mu) / jnp.sqrt(var + 1e-5) * g + b

    out = x
    for p in layer_params:
        xh = out.reshape(B, S, heads, Dh)
        q = jnp.einsum("bshd,ed->bshe", xh, p["wq"])
        k = jnp.einsum("bshd,ed->bshe", xh, p["wk"])
        v = jnp.einsum("bshd,ed->bshe", xh, p["wv"])
        energy = jnp.einsum("bqhd,bkhd->bhqk", q, k)
        energy = jnp.where(mask[:, None, :, :] == 0, -1e20, energy)
        attn = jax.nn.softmax(energy / math.sqrt(E), axis=-1)
        ao = jnp.einsum("bhqk,bkhd->bqhd", attn, v).reshape(B, S, E)
        ao = ao @ p["wo"].T + p["bo"]
        h1 = ln(ao + out, p["g1"], p["b1"])
        ff = jnp.maximum(h1 @ p["wf1"].T + p["bf1"], 0.0) @ p["wf2"].T + p["bf2"]
        out = ln(ff + h1, p["g2"], p["b2"])
    return out


if __name__ == "__main__":
    B, S, hid_dim, heads, layers = 2, 8, 32, 8, 2

    key = jax.random.PRNGKey(0)
    kx, *kls = jax.random.split(key, 1 + layers)
    x = jax.random.normal(kx, (B, S, hid_dim), jnp.float32)
    # Causal mask (1 = attend, 0 = masked), broadcast over batch.
    mask = jnp.broadcast_to(jnp.tril(jnp.ones((S, S), jnp.float32)), (B, S, S))

    params = [init_layer_params(k, hid_dim, heads) for k in kls]

    out = my_transformer(x, mask, params, heads=heads)
    out = jax.block_until_ready(out)

    ref = my_transformer_ref(x, mask, params, heads=heads)
    assert out.shape == (B, S, hid_dim)
    max_err = float(jnp.max(jnp.abs(out - ref)))
    # bf16 matmuls (f32 accumulation) + approx softmax reciprocal vs f32 reference.
    assert jnp.allclose(out, ref, atol=5e-2, rtol=5e-2), (
        f"mismatch vs JAX reference (max abs err {max_err})")

    print("KERNEL_OK")
</pallas_src>

<mosaic_0001>
module attributes {stable_mosaic.version = 11 : i64} {
  func.func @fused_transformer_kernel(%arg0: i32, %arg1: i32, %arg2: memref<1x8x32xf32, #tpu.memory_space<vmem>>, %arg3: memref<1x8x8xf32, #tpu.memory_space<vmem>>, %arg4: memref<1x32x96xbf16, #tpu.memory_space<vmem>>, %arg5: memref<1x32x32xbf16, #tpu.memory_space<vmem>>, %arg6: memref<1x1x32xf32, #tpu.memory_space<vmem>>, %arg7: memref<1x1x32xf32, #tpu.memory_space<vmem>>, %arg8: memref<1x1x32xf32, #tpu.memory_space<vmem>>, %arg9: memref<1x32x128xbf16, #tpu.memory_space<vmem>>, %arg10: memref<1x1x128xf32, #tpu.memory_space<vmem>>, %arg11: memref<1x128x32xbf16, #tpu.memory_space<vmem>>, %arg12: memref<1x1x32xf32, #tpu.memory_space<vmem>>, %arg13: memref<1x1x32xf32, #tpu.memory_space<vmem>>, %arg14: memref<1x1x32xf32, #tpu.memory_space<vmem>>, %arg15: memref<1x8x32xf32, #tpu.memory_space<vmem>>) attributes {dimension_semantics = [#tpu.dimension_semantics<parallel>, #tpu.dimension_semantics<arbitrary>], iteration_bounds = array<i64: 2, 2>, scalar_prefetch = 0 : i64, scratch_operands = 0 : i64, tpu.core_type = #tpu.core_type<tc>, window_params = [{transform_indices = @transform_0, window_bounds = array<i64: 1, 8, 32>}, {transform_indices = @transform_1, window_bounds = array<i64: 1, 8, 8>}, {transform_indices = @transform_2, window_bounds = array<i64: 1, 32, 96>}, {transform_indices = @transform_3, window_bounds = array<i64: 1, 32, 32>}, {transform_indices = @transform_4, window_bounds = array<i64: 1, 1, 32>}, {transform_indices = @transform_5, window_bounds = array<i64: 1, 1, 32>}, {transform_indices = @transform_6, window_bounds = array<i64: 1, 1, 32>}, {transform_indices = @transform_7, window_bounds = array<i64: 1, 32, 128>}, {transform_indices = @transform_8, window_bounds = array<i64: 1, 1, 128>}, {transform_indices = @transform_9, window_bounds = array<i64: 1, 128, 32>}, {transform_indices = @transform_10, window_bounds = array<i64: 1, 1, 32>}, {transform_indices = @transform_11, window_bounds = array<i64: 1, 1, 32>}, {transform_indices = @transform_12, window_bounds = array<i64: 1, 1, 32>}, {transform_indices = @transform_13, window_bounds = array<i64: 1, 8, 32>}]} {
    %c0_i32 = arith.constant 0 : i32
    %0 = arith.cmpi eq, %arg1, %c0_i32 : i32
    %1 = arith.extui %0 : i1 to i32
    %c0_i32_0 = arith.constant 0 : i32
    %2 = arith.cmpi ne, %1, %c0_i32_0 : i32
    scf.if %2 {
      %c0_60 = arith.constant 0 : index
      %c0_61 = arith.constant 0 : index
      %c0_62 = arith.constant 0 : index
      %122 = vector.load %arg2[%c0_60, %c0_61, %c0_62] : memref<1x8x32xf32, #tpu.memory_space<vmem>>, vector<1x8x32xf32>
      %c0_63 = arith.constant 0 : index
      %c0_64 = arith.constant 0 : index
      %c0_65 = arith.constant 0 : index
      %123 = vector.load %arg15[%c0_63, %c0_64, %c0_65] : memref<1x8x32xf32, #tpu.memory_space<vmem>>, vector<1x8x32xf32>
      tpu.vector_store %arg15[%c0_63, %c0_64, %c0_65], %122 {strides = array<i32>} : memref<1x8x32xf32, #tpu.memory_space<vmem>>, vector<1x8x32xf32>,
    } else {
    }
    %c0 = arith.constant 0 : index
    %c0_1 = arith.constant 0 : index
    %c0_2 = arith.constant 0 : index
    %3 = vector.load %arg15[%c0, %c0_1, %c0_2] : memref<1x8x32xf32, #tpu.memory_space<vmem>>, vector<1x8x32xf32>
    %4 = vector.shape_cast %3 : vector<1x8x32xf32> to vector<8x32xf32>
    %5 = arith.truncf %4 : vector<8x32xf32> to vector<8x32xbf16>
    %c0_3 = arith.constant 0 : index
    %c0_4 = arith.constant 0 : index
    %c0_5 = arith.constant 0 : index
    %6 = vector.load %arg4[%c0_3, %c0_4, %c0_5] : memref<1x32x96xbf16, #tpu.memory_space<vmem>>, vector<1x32x96xbf16>
    %7 = vector.shape_cast %6 : vector<1x32x96xbf16> to vector<32x96xbf16>
    %cst = arith.constant dense<0.000000e+00> : vector<8x96xf32>
    %8 = tpu.matmul %5, %7, %cst {dimension_numbers = #tpu.dot_dimension_numbers<[1], [0], [0], [1], [0, 0, 1, 1], [], []>} : vector<8x32xbf16>, vector<32x96xbf16>, vector<8x96xf32> -> vector<8x96xf32>
    %9 = arith.truncf %8 : vector<8x96xf32> to vector<8x96xbf16>
    %10 = vector.extract_strided_slice %9 {offsets = [0, 0], sizes = [8, 32], strides = [1, 1]} : vector<8x96xbf16> to vector<8x32xbf16>
    %11 = vector.shape_cast %10 : vector<8x32xbf16> to vector<8x8x4xbf16>
    %12 = tpu.transpose %11, [1, 0, 2] : vector<8x8x4xbf16> -> vector<8x8x4xbf16>
    %13 = vector.extract_strided_slice %9 {offsets = [0, 32], sizes = [8, 32], strides = [1, 1]} : vector<8x96xbf16> to vector<8x32xbf16>
    %14 = vector.shape_cast %13 : vector<8x32xbf16> to vector<8x8x4xbf16>
    %15 = tpu.transpose %14, [1, 0, 2] : vector<8x8x4xbf16> -> vector<8x8x4xbf16>
    %16 = vector.extract_strided_slice %9 {offsets = [0, 64], sizes = [8, 32], strides = [1, 1]} : vector<8x96xbf16> to vector<8x32xbf16>
    %17 = vector.shape_cast %16 : vector<8x32xbf16> to vector<8x8x4xbf16>
    %18 = tpu.transpose %17, [1, 0, 2] : vector<8x8x4xbf16> -> vector<8x8x4xbf16>
    "tpu.trace_start"() <{level = 10 : i32, message = "hqd,hkd->hqk"}> : () -> ()
    %cst_6 = arith.constant dense<0.000000e+00> : vector<8x8x8xf32>
    %19 = tpu.matmul %12, %15, %cst_6 {dimension_numbers = #tpu.dot_dimension_numbers<[2], [2], [1], [1], [0, 0, 0, 1, 1, 1], [0], [0]>} : vector<8x8x4xbf16>, vector<8x8x4xbf16>, vector<8x8x8xf32> -> vector<8x8x8xf32>
    "tpu.trace_stop"() : () -> ()
    %c0_7 = arith.constant 0 : index
    %c0_8 = arith.constant 0 : index
    %c0_9 = arith.constant 0 : index
    %20 = vector.load %arg3[%c0_7, %c0_8, %c0_9] : memref<1x8x8xf32, #tpu.memory_space<vmem>>, vector<1x8x8xf32>
    %21 = vector.shape_cast %20 : vector<1x8x8xf32> to vector<8x8xf32>
    %22 = vector.shape_cast %21 : vector<8x8xf32> to vector<1x8x8xf32>
    %23 = vector.broadcast %22 : vector<1x8x8xf32> to vector<8x8x8xf32>
    %24 = arith.addf %19, %23 : vector<8x8x8xf32>
    %cst_10 = arith.constant dense<0xFF800000> : vector<8x8xf32>
    %25 = vector.multi_reduction <maximumf>, %24, %cst_10 [2] : vector<8x8x8xf32> to vector<8x8xf32>
    %26 = vector.shape_cast %25 : vector<8x8xf32> to vector<8x8x1xf32>
    %27 = vector.broadcast %26 : vector<8x8x1xf32> to vector<8x8x8xf32>
    %28 = arith.subf %24, %27 : vector<8x8x8xf32>
    %29 = math.exp %28 : vector<8x8x8xf32>
    %cst_11 = arith.constant dense<0.000000e+00> : vector<8x8xf32>
    %30 = vector.multi_reduction <add>, %29, %cst_11 [2] : vector<8x8x8xf32> to vector<8x8xf32>
    %31 = vector.shape_cast %30 : vector<8x8xf32> to vector<8x8x1xf32>
    %32 = tpu.reciprocal %31 {approx = true} : vector<8x8x1xf32> -> vector<8x8x1xf32>
    %33 = vector.broadcast %32 : vector<8x8x1xf32> to vector<8x8x8xf32>
    %34 = arith.mulf %29, %33 : vector<8x8x8xf32>
    %35 = arith.truncf %34 : vector<8x8x8xf32> to vector<8x8x8xbf16>
    "tpu.trace_start"() <{level = 10 : i32, message = "hqk,hkd->hqd"}> : () -> ()
    %cst_12 = arith.constant dense<0.000000e+00> : vector<8x8x4xf32>
    %36 = tpu.matmul %35, %18, %cst_12 {dimension_numbers = #tpu.dot_dimension_numbers<[2], [1], [1], [2], [0, 0, 0, 1, 1, 2], [0], [0]>} : vector<8x8x8xbf16>, vector<8x8x4xbf16>, vector<8x8x4xf32> -> vector<8x8x4xf32>
    "tpu.trace_stop"() : () -> ()
    %37 = tpu.transpose %36, [1, 0, 2] : vector<8x8x4xf32> -> vector<8x8x4xf32>
    %38 = vector.shape_cast %37 : vector<8x8x4xf32> to vector<8x32xf32>
    %39 = arith.truncf %38 : vector<8x32xf32> to vector<8x32xbf16>
    %c0_13 = arith.constant 0 : index
    %c0_14 = arith.constant 0 : index
    %c0_15 = arith.constant 0 : index
    %40 = vector.load %arg5[%c0_13, %c0_14, %c0_15] : memref<1x32x32xbf16, #tpu.memory_space<vmem>>, vector<1x32x32xbf16>
    %41 = vector.shape_cast %40 : vector<1x32x32xbf16> to vector<32x32xbf16>
    %cst_16 = arith.constant dense<0.000000e+00> : vector<8x32xf32>
    %42 = tpu.matmul %39, %41, %cst_16 {dimension_numbers = #tpu.dot_dimension_numbers<[1], [0], [0], [1], [0, 0, 1, 1], [], []>} : vector<8x32xbf16>, vector<32x32xbf16>, vector<8x32xf32> -> vector<8x32xf32>
    %c0_17 = arith.constant 0 : index
    %c0_18 = arith.constant 0 : index
    %c0_19 = arith.constant 0 : index
    %43 = vector.load %arg6[%c0_17, %c0_18, %c0_19] : memref<1x1x32xf32, #tpu.memory_space<vmem>>, vector<1x1x32xf32>
    %44 = vector.shape_cast %43 : vector<1x1x32xf32> to vector<1x32xf32>
    %45 = vector.broadcast %44 : vector<1x32xf32> to vector<8x32xf32>
    %46 = arith.addf %42, %45 : vector<8x32xf32>
    %47 = arith.addf %46, %4 : vector<8x32xf32>
    %c0_20 = arith.constant 0 : index
    %c0_21 = arith.constant 0 : index
    %c0_22 = arith.constant 0 : index
    %48 = vector.load %arg7[%c0_20, %c0_21, %c0_22] : memref<1x1x32xf32, #tpu.memory_space<vmem>>, vector<1x1x32xf32>
    %49 = vector.shape_cast %48 : vector<1x1x32xf32> to vector<1x32xf32>
    %c0_23 = arith.constant 0 : index
    %c0_24 = arith.constant 0 : index
    %c0_25 = arith.constant 0 : index
    %50 = vector.load %arg8[%c0_23, %c0_24, %c0_25] : memref<1x1x32xf32, #tpu.memory_space<vmem>>, vector<1x1x32xf32>
    %51 = vector.shape_cast %50 : vector<1x1x32xf32> to vector<1x32xf32>
    %cst_26 = arith.constant dense<0.000000e+00> : vector<8xf32>
    %52 = vector.multi_reduction <add>, %47, %cst_26 [1] : vector<8x32xf32> to vector<8xf32>
    %53 = vector.shape_cast %52 : vector<8xf32> to vector<8x1xf32>
    %cst_27 = arith.constant 3.200000e+01 : f32
    %54 = vector.broadcast %cst_27 : f32 to vector<8x1xf32>
    %55 = arith.divf %53, %54 : vector<8x1xf32>
    %56 = vector.broadcast %55 : vector<8x1xf32> to vector<8x32xf32>
    %57 = arith.subf %47, %56 : vector<8x32xf32>
    %58 = arith.mulf %57, %57 : vector<8x32xf32>
    %cst_28 = arith.constant dense<0.000000e+00> : vector<8xf32>
    %59 = vector.multi_reduction <add>, %58, %cst_28 [1] : vector<8x32xf32> to vector<8xf32>
    %60 = vector.shape_cast %59 : vector<8xf32> to vector<8x1xf32>
    %cst_29 = arith.constant 3.200000e+01 : f32
    %61 = vector.broadcast %cst_29 : f32 to vector<8x1xf32>
    %62 = arith.divf %60, %61 : vector<8x1xf32>
    %63 = vector.broadcast %55 : vector<8x1xf32> to vector<8x32xf32>
    %64 = arith.subf %47, %63 : vector<8x32xf32>
    %cst_30 = arith.constant 9.99999974E-6 : f32
    %65 = vector.broadcast %cst_30 : f32 to vector<8x1xf32>
    %66 = arith.addf %62, %65 : vector<8x1xf32>
    %67 = math.rsqrt %66 : vector<8x1xf32>
    %68 = vector.broadcast %67 : vector<8x1xf32> to vector<8x32xf32>
    %69 = arith.mulf %64, %68 : vector<8x32xf32>
    %70 = vector.broadcast %49 : vector<1x32xf32> to vector<8x32xf32>
    %71 = arith.mulf %69, %70 : vector<8x32xf32>
    %72 = vector.broadcast %51 : vector<1x32xf32> to vector<8x32xf32>
    %73 = arith.addf %71, %72 : vector<8x32xf32>
    %74 = arith.truncf %73 : vector<8x32xf32> to vector<8x32xbf16>
    %c0_31 = arith.constant 0 : index
    %c0_32 = arith.constant 0 : index
    %c0_33 = arith.constant 0 : index
    %75 = vector.load %arg9[%c0_31, %c0_32, %c0_33] : memref<1x32x128xbf16, #tpu.memory_space<vmem>>, vector<1x32x128xbf16>
    %76 = vector.shape_cast %75 : vector<1x32x128xbf16> to vector<32x128xbf16>
    %cst_34 = arith.constant dense<0.000000e+00> : vector<8x128xf32>
    %77 = tpu.matmul %74, %76, %cst_34 {dimension_numbers = #tpu.dot_dimension_numbers<[1], [0], [0], [1], [0, 0, 1, 1], [], []>} : vector<8x32xbf16>, vector<32x128xbf16>, vector<8x128xf32> -> vector<8x128xf32>
    %c0_35 = arith.constant 0 : index
    %c0_36 = arith.constant 0 : index
    %c0_37 = arith.constant 0 : index
    %78 = vector.load %arg10[%c0_35, %c0_36, %c0_37] : memref<1x1x128xf32, #tpu.memory_space<vmem>>, vector<1x1x128xf32>
    %79 = vector.shape_cast %78 : vector<1x1x128xf32> to vector<1x128xf32>
    %80 = vector.broadcast %79 : vector<1x128xf32> to vector<8x128xf32>
    %81 = arith.addf %77, %80 : vector<8x128xf32>
    %cst_38 = arith.constant 0.000000e+00 : f32
    %82 = vector.broadcast %cst_38 : f32 to vector<8x128xf32>
    %83 = arith.maximumf %81, %82 : vector<8x128xf32>
    %84 = arith.truncf %83 : vector<8x128xf32> to vector<8x128xbf16>
    %c0_39 = arith.constant 0 : index
    %c0_40 = arith.constant 0 : index
    %c0_41 = arith.constant 0 : index
    %85 = vector.load %arg11[%c0_39, %c0_40, %c0_41] : memref<1x128x32xbf16, #tpu.memory_space<vmem>>, vector<1x128x32xbf16>
    %86 = vector.shape_cast %85 : vector<1x128x32xbf16> to vector<128x32xbf16>
    %cst_42 = arith.constant dense<0.000000e+00> : vector<8x32xf32>
    %87 = tpu.matmul %84, %86, %cst_42 {dimension_numbers = #tpu.dot_dimension_numbers<[1], [0], [0], [1], [0, 0, 1, 1], [], []>} : vector<8x128xbf16>, vector<128x32xbf16>, vector<8x32xf32> -> vector<8x32xf32>
    %c0_43 = arith.constant 0 : index
    %c0_44 = arith.constant 0 : index
    %c0_45 = arith.constant 0 : index
    %88 = vector.load %arg12[%c0_43, %c0_44, %c0_45] : memref<1x1x32xf32, #tpu.memory_space<vmem>>, vector<1x1x32xf32>
    %89 = vector.shape_cast %88 : vector<1x1x32xf32> to vector<1x32xf32>
    %90 = vector.broadcast %89 : vector<1x32xf32> to vector<8x32xf32>
    %91 = arith.addf %87, %90 : vector<8x32xf32>
    %92 = arith.addf %91, %73 : vector<8x32xf32>
    %c0_46 = arith.constant 0 : index
    %c0_47 = arith.constant 0 : index
    %c0_48 = arith.constant 0 : index
    %93 = vector.load %arg13[%c0_46, %c0_47, %c0_48] : memref<1x1x32xf32, #tpu.memory_space<vmem>>, vector<1x1x32xf32>
    %94 = vector.shape_cast %93 : vector<1x1x32xf32> to vector<1x32xf32>
    %c0_49 = arith.constant 0 : index
    %c0_50 = arith.constant 0 : index
    %c0_51 = arith.constant 0 : index
    %95 = vector.load %arg14[%c0_49, %c0_50, %c0_51] : memref<1x1x32xf32, #tpu.memory_space<vmem>>, vector<1x1x32xf32>
    %96 = vector.shape_cast %95 : vector<1x1x32xf32> to vector<1x32xf32>
    %cst_52 = arith.constant dense<0.000000e+00> : vector<8xf32>
    %97 = vector.multi_reduction <add>, %92, %cst_52 [1] : vector<8x32xf32> to vector<8xf32>
    %98 = vector.shape_cast %97 : vector<8xf32> to vector<8x1xf32>
    %cst_53 = arith.constant 3.200000e+01 : f32
    %99 = vector.broadcast %cst_53 : f32 to vector<8x1xf32>
    %100 = arith.divf %98, %99 : vector<8x1xf32>
    %101 = vector.broadcast %100 : vector<8x1xf32> to vector<8x32xf32>
    %102 = arith.subf %92, %101 : vector<8x32xf32>
    %103 = arith.mulf %102, %102 : vector<8x32xf32>
    %cst_54 = arith.constant dense<0.000000e+00> : vector<8xf32>
    %104 = vector.multi_reduction <add>, %103, %cst_54 [1] : vector<8x32xf32> to vector<8xf32>
    %105 = vector.shape_cast %104 : vector<8xf32> to vector<8x1xf32>
    %cst_55 = arith.constant 3.200000e+01 : f32
    %106 = vector.broadcast %cst_55 : f32 to vector<8x1xf32>
    %107 = arith.divf %105, %106 : vector<8x1xf32>
    %108 = vector.broadcast %100 : vector<8x1xf32> to vector<8x32xf32>
    %109 = arith.subf %92, %108 : vector<8x32xf32>
    %cst_56 = arith.constant 9.99999974E-6 : f32
    %110 = vector.broadcast %cst_56 : f32 to vector<8x1xf32>
    %111 = arith.addf %107, %110 : vector<8x1xf32>
    %112 = math.rsqrt %111 : vector<8x1xf32>
    %113 = vector.broadcast %112 : vector<8x1xf32> to vector<8x32xf32>
    %114 = arith.mulf %109, %113 : vector<8x32xf32>
    %115 = vector.broadcast %94 : vector<1x32xf32> to vector<8x32xf32>
    %116 = arith.mulf %114, %115 : vector<8x32xf32>
    %117 = vector.broadcast %96 : vector<1x32xf32> to vector<8x32xf32>
    %118 = arith.addf %116, %117 : vector<8x32xf32>
    %c0_57 = arith.constant 0 : index
    %c0_58 = arith.constant 0 : index
    %c0_59 = arith.constant 0 : index
    %119 = vector.load %arg15[%c0_57, %c0_58, %c0_59] : memref<1x8x32xf32, #tpu.memory_space<vmem>>, vector<1x8x32xf32>
    %120 = vector.shape_cast %119 : vector<1x8x32xf32> to vector<8x32xf32>
    %121 = vector.shape_cast %118 : vector<8x32xf32> to vector<1x8x32xf32>
    tpu.vector_store %arg15[%c0_57, %c0_58, %c0_59], %121 {strides = array<i32>} : memref<1x8x32xf32, #tpu.memory_space<vmem>>, vector<1x8x32xf32>,
    return
  }
  func.func @transform_0(%arg0: i32, %arg1: i32) -> (i32, i32, i32) {
    %c0_i32 = arith.constant 0 : i32
    %c0_i32_0 = arith.constant 0 : i32
    %c0_i32_1 = arith.constant 0 : i32
    return %arg0, %c0_i32, %c0_i32_0 : i32, i32, i32
  }
  func.func @transform_1(%arg0: i32, %arg1: i32) -> (i32, i32, i32) {
    %c0_i32 = arith.constant 0 : i32
    %c0_i32_0 = arith.constant 0 : i32
    %c0_i32_1 = arith.constant 0 : i32
    return %arg0, %c0_i32, %c0_i32_0 : i32, i32, i32
  }
  func.func @transform_2(%arg0: i32, %arg1: i32) -> (i32, i32, i32) {
    %c0_i32 = arith.constant 0 : i32
    %c0_i32_0 = arith.constant 0 : i32
    %c0_i32_1 = arith.constant 0 : i32
    return %arg1, %c0_i32, %c0_i32_0 : i32, i32, i32
  }
  func.func @transform_3(%arg0: i32, %arg1: i32) -> (i32, i32, i32) {
    %c0_i32 = arith.constant 0 : i32
    %c0_i32_0 = arith.constant 0 : i32
    %c0_i32_1 = arith.constant 0 : i32
    return %arg1, %c0_i32, %c0_i32_0 : i32, i32, i32
  }
  func.func @transform_4(%arg0: i32, %arg1: i32) -> (i32, i32, i32) {
    %c0_i32 = arith.constant 0 : i32
    %c0_i32_0 = arith.constant 0 : i32
    %c0_i32_1 = arith.constant 0 : i32
    return %arg1, %c0_i32, %c0_i32_0 : i32, i32, i32
  }
  func.func @transform_5(%arg0: i32, %arg1: i32) -> (i32, i32, i32) {
    %c0_i32 = arith.constant 0 : i32
    %c0_i32_0 = arith.constant 0 : i32
    %c0_i32_1 = arith.constant 0 : i32
    return %arg1, %c0_i32, %c0_i32_0 : i32, i32, i32
  }
  func.func @transform_6(%arg0: i32, %arg1: i32) -> (i32, i32, i32) {
    %c0_i32 = arith.constant 0 : i32
    %c0_i32_0 = arith.constant 0 : i32
    %c0_i32_1 = arith.constant 0 : i32
    return %arg1, %c0_i32, %c0_i32_0 : i32, i32, i32
  }
  func.func @transform_7(%arg0: i32, %arg1: i32) -> (i32, i32, i32) {
    %c0_i32 = arith.constant 0 : i32
    %c0_i32_0 = arith.constant 0 : i32
    %c0_i32_1 = arith.constant 0 : i32
    return %arg1, %c0_i32, %c0_i32_0 : i32, i32, i32
  }
  func.func @transform_8(%arg0: i32, %arg1: i32) -> (i32, i32, i32) {
    %c0_i32 = arith.constant 0 : i32
    %c0_i32_0 = arith.constant 0 : i32
    %c0_i32_1 = arith.constant 0 : i32
    return %arg1, %c0_i32, %c0_i32_0 : i32, i32, i32
  }
  func.func @transform_9(%arg0: i32, %arg1: i32) -> (i32, i32, i32) {
    %c0_i32 = arith.constant 0 : i32
    %c0_i32_0 = arith.constant 0 : i32
    %c0_i32_1 = arith.constant 0 : i32
    return %arg1, %c0_i32, %c0_i32_0 : i32, i32, i32
  }
  func.func @transform_10(%arg0: i32, %arg1: i32) -> (i32, i32, i32) {
    %c0_i32 = arith.constant 0 : i32
    %c0_i32_0 = arith.constant 0 : i32
    %c0_i32_1 = arith.constant 0 : i32
    return %arg1, %c0_i32, %c0_i32_0 : i32, i32, i32
  }
  func.func @transform_11(%arg0: i32, %arg1: i32) -> (i32, i32, i32) {
    %c0_i32 = arith.constant 0 : i32
    %c0_i32_0 = arith.constant 0 : i32
    %c0_i32_1 = arith.constant 0 : i32
    return %arg1, %c0_i32, %c0_i32_0 : i32, i32, i32
  }
  func.func @transform_12(%arg0: i32, %arg1: i32) -> (i32, i32, i32) {
    %c0_i32 = arith.constant 0 : i32
    %c0_i32_0 = arith.constant 0 : i32
    %c0_i32_1 = arith.constant 0 : i32
    return %arg1, %c0_i32, %c0_i32_0 : i32, i32, i32
  }
  func.func @transform_13(%arg0: i32, %arg1: i32) -> (i32, i32, i32) {
    %c0_i32 = arith.constant 0 : i32
    %c0_i32_0 = arith.constant 0 : i32
    %c0_i32_1 = arith.constant 0 : i32
    return %arg0, %c0_i32, %c0_i32_0 : i32, i32, i32
  }
}

</mosaic_0001>

<bundles_post_ra>
// kernel: tpu_custom_call.1
= control target key start
LH: loop header
LB: loop body
LE: loop exit
PB: predicated region body
PF: predicated region fallthrough
CT: control target
= control target key end

     0   :  { %s4218_s0 = inlined_call_operand.vmem [shape: f32[2,8,32], index: 0, kind: input, shape index: {}]   ;;  %s4219_s1 = inlined_call_operand.vmem [shape: f32[2,8,8], index: 1, kind: input, shape index: {}]   ;;  %s4220_s2 = inlined_call_operand.vmem [shape: bf16[2,32,96], index: 2, kind: input, shape index: {}]   ;;  %s4221_s3 = inlined_call_operand.vmem [shape: bf16[2,32,32], index: 3, kind: input, shape index: {}]   ;;  %s4222_s4 = inlined_call_operand.vmem [shape: f32[2,1,32], index: 4, kind: input, shape index: {}]   ;;  %s4223_s5 = inlined_call_operand.vmem [shape: f32[2,1,32], index: 5, kind: input, shape index: {}]   ;;  %s4224_s6 = inlined_call_operand.vmem [shape: f32[2,1,32], index: 6, kind: input, shape index: {}]   ;;  %s4225_s7 = inlined_call_operand.vmem [shape: bf16[2,32,128], index: 7, kind: input, shape index: {}]   ;;  %s4226_s8 = inlined_call_operand.vmem [shape: f32[2,1,128], index: 8, kind: input, shape index: {}]   ;;  %s4227_s9 = inlined_call_operand.vmem [shape: bf16[2,128,32], index: 9, kind: input, shape index: {}]   ;;  %s4228_s10 = inlined_call_operand.vmem [shape: f32[2,1,32], index: 10, kind: input, shape index: {}]   ;;  %s4229_s11 = inlined_call_operand.vmem [shape: f32[2,1,32], index: 11, kind: input, shape index: {}]   ;;  %s4230_s12 = inlined_call_operand.vmem [shape: f32[2,1,32], index: 12, kind: input, shape index: {}]   ;;  %s4231_s13 = inlined_call_operand.hbm [shape: f32[2,8,32], index: 13, kind: output, shape index: {}]  }
   0x1   :  { %4247 = sst [smem:[#allocation18_spill]] %s4218_s0 }
   0x2   :  { %4248 = sst [smem:[#allocation19_spill]] %s4219_s1 }
   0x3   :  { %4249 = sst [smem:[#allocation20_spill]] %s4220_s2 }
   0x4   :  { %4250 = sst [smem:[#allocation21_spill]] %s4221_s3 }
   0x5   :  { %4251 = sst [smem:[#allocation22_spill]] %s4225_s7 }
   0x6   :  { %4252 = sst [smem:[#allocation23_spill]] %s4230_s12 }
   0x7   :  { %4253 = sst [smem:[#allocation24_spill]] %s4231_s13 }
   0x8   :  { %18 = vsyncpa [#allocation3], 0 }
   0x9   :  { %20 = vsyncpa [#allocation3 + $0x1], 0  ;;  %s3618_s25 = smov 0   ;;  %s3620_s26 = smov 0  }
   0xa   :  { %s3622_s27 = smov 0   ;;  %s3624_s28 = smov 0  }
   0xb   :  { %s3626_s29 = smov 0   ;;  %s3628_s30 = smov 0  }
   0xc   :  { %s3630_s14 = smov 0   ;;  %s3632_s15 = smov 0  }
   0xd LB: > { %4254 = sst [smem:[#allocation5_spill]] %s3496_s25  ;;  %s3024_s16 = sadd.s32 4294967295, %s3524_s15   ;;  %s3524_s15 = sphi %s3632_s15, %s26_s15   ;;  %s3520_s14 = sphi %s3630_s14, %s4294_s14   ;;  %s3516_s30 = sphi %s3628_s30, %s4293_s30   ;;  %s3512_s29 = sphi %s3626_s29, %s4292_s29   ;;  %s3508_s28 = sphi %s3624_s28, %s4291_s28   ;;  %s3504_s27 = sphi %s3622_s27, %s4290_s27   ;;  %s3500_s26 = sphi %s3620_s26, %s4289_s26   ;;  %s3496_s25 = sphi %s3618_s25, %s4288_s25  }
   0xe   : > { %4255 = sst [smem:[#allocation6_spill]] %s3500_s26  ;;  %s3025_s17 = sadd.s32 4294967294, %s3524_s15  }
   0xf   : > { %4256 = sst [smem:[#allocation7_spill]] %s3504_s27  ;;  %s35_s18 = sadd.s32 1, %s3516_s30 }
  0x10   : > { %4257 = sst [smem:[#allocation8_spill]] %s3508_s28  ;;  %p36_p0 = scmp.ge.s32.totalorder %s35_s18, 2 }
  0x11   : > { %4258 = sst [smem:[#allocation9_spill]] %s3512_s29  ;;  %s38_s19 = sadd.s32 1, %s3520_s14 }
  0x12   : > { %4259 = sst [smem:[#allocation10_spill]] %s3516_s30  ;;  %p393_p1 = scmp.ne.s32.totalorder %s3504_s27, %s3500_s26 }
  0x13   : > { %4260 = sst [smem:[#allocation11_spill]] %s3520_s14  ;;  %p394_p2 = scmp.eq.s32.totalorder %s3024_s16, 3 }
  0x14   : > { %4261 = sst [smem:[#allocation12_spill]] %s3524_s15  ;;  %s4296_s18 = smov (%p36_p0, %s35_s18), 0 }
  0x15   : > { %4262 = sst [smem:[#allocation13_spill]] %s4296_s18  ;;  %s4298_s19 = smov (!%p36_p0, %s38_s19), %s3520_s14 }
  0x16   : > { %p3667_p3 = por %p394_p2, %p393_p1  ;;  %p399_p4 = scmp.ne.s32.totalorder %s3500_s26, %s3496_s25 }
  0x17   : > { %p40_p5 = scmp.ge.s32.totalorder %s4298_s19, 2  ;;  %p400_p6 = scmp.eq.s32.totalorder %s3025_s17, 3 }
  0x18   : > { %s4263_s20 = scalar_select %p3667_p3, 1, 0 }
  0x19   : > { %p3028_p7 = scmp.ge.s32.totalorder %s3524_s15, 1  ;;  %p506_p8 = scmp.lt.s32.totalorder %s3524_s15, 5 }
  0x1a   : > { %4264 = sst [smem:[#allocation14_spill]] %s4263_s20  ;;  %s4300_s19 = smov (%p40_p5, %s4298_s19), 0 }
  0x1b   : > { %4265 = sst [smem:[#allocation15_spill]] %s4300_s19  ;;  %p3677_p9 = por %p400_p6, %p399_p4 }
  0x1c   : > { %p507_p10 = pnand %p3028_p7, %p506_p8  ;;  %s380_s22 = ssub.s32 %s3520_s14, %s4300_s19 }
  0x1d   : > { %s4266_s21 = scalar_select %p3677_p9, 1, 0 }
  0x1e   : > { %s383_s23 = sadd.s32 1, %s3504_s27  ;;  %p381_p11 = scmp.eq.s32.totalorder %s380_s22, 0 }
  0x1f   : > { %4267 = sst [smem:[#allocation16_spill]] %s4266_s21  ;;  %510 = sbr.rel (%p507_p10) target bundleno = 2769 (0xad1), region = 72 }
  0x20   : > { %s3685_s24 = scalar_select %p381_p11, %s3504_s27, %s383_s23  }
  0x21   : > { %s4235_s16 = sand.u32 (!%p507_p10), 1, %s3500_s26   ;;  %p594_p12 = scmp.lt.s32.totalorder (!%p507_p10), %s3512_s29, 1 }
  0x22   : > { %4268 = sst [smem:[#allocation17_spill]] %s3685_s24  ;;  %s3029_s17 = sshll.u32 (!%p507_p10), %s4235_s16, 3 }
  0x23   : > { %p602_p13 = scmp.lt.s32.totalorder (!%p507_p10), %s3508_s28, 1  ;;  %s4269_s0 = sld [smem:[#allocation18_spill]] (!%p507_p10) }
  0x24   : > { %s4270_s1 = sld [smem:[#allocation19_spill]] (!%p507_p10)  ;;  %s4271_s2 = sld [smem:[#allocation20_spill]] (!%p507_p10) }
  0x25   : > { %s4272_s3 = sld [smem:[#allocation21_spill]] (!%p507_p10)  ;;  %s4273_s7 = sld [smem:[#allocation22_spill]] (!%p507_p10) }
  0x26   : > { %s595_s18 = scalar_select %p594_p12, %s3512_s29, 1 }
  0x27   : > { %s3694_s30 = scalar_select %p602_p13, %s3508_s28, 1 }
  0x28   : > { %s3030_s22 = sshll.u32 %s595_s18, 3  ;;  %s3752_s26 = scalar_lea.vmem [#allocation2], %s3029_s17 }
  0x29   : > { %s597_s14 = scalar_lea.vmem %s4269_s0, %s3030_s22  ;;  %s3093_s21 = sshll.u32 %s3694_s30, 4 }
  0x2a   : > { %s3702_s27 = scalar_lea.vmem %s4270_s1, %s3030_s22  ;;  %s606_s29 = scalar_lea.vmem %s4271_s2, %s3093_s21 }
  0x2b   : > { %s3715_s12 = scalar_lea.vmem %s4272_s3, %s3093_s21  ;;  %s3728_s15 = scalar_lea.vmem %s4273_s7, %s3093_s21 }
  0x2c   : > { %s628_s13 = scalar_lea.vmem %s4226_s8, %s3694_s30  ;;  %s3096_s28 = sshll.u32 %s3694_s30, 6 }
  0x2d   : > { %s636_s3 = scalar_lea.vmem %s4228_s10, %s3694_s30  ;;  %s3742_s24 = scalar_lea.vmem %s4227_s9, %s3096_s28 }
  0x2e   : > { %s639_s1 = scalar_lea.vmem %s4229_s11, %s3694_s30  ;;  %s4274_s0 = sld [smem:[#allocation23_spill]] }
  0x2f   : > { %s4275_s20 = sld [smem:[#allocation8_spill]] }
  0x34   : > { %s642_s7 = scalar_lea.vmem %s4274_s0, %s3694_s30 }
  0x35   : > { %p3040_p0 = scmp.ne.s32.totalorder %s4275_s20, 0 }
  0x36   : > { %v648_v0 = vld [vmem:[%s597_s14] sm:$0xff] (!%p3040_p0)  ;;  %vm649_vm0 = vcmask (!%p3040_p0), 261120  }
  0x37   : > { %647 = sbr.rel (%p3040_p0) target bundleno = 62 (0x3e), region = 76  ;;  %650 = vst.msk [vmem:[%s3752_s26] sm:$0xff] (!%p3040_p0), %vm649_vm0, %v648_v0 }
  0x3e PF: > { %v3379_v1 = vld [vmem:[%s606_s29] sm:$0xff]   ;;  %v3526_v2 = vmov 0.0   ;;  %v3380_v3 = vld [vmem:[%s606_s29 + $0x8] sm:$0xff]   ;;  %vm3527_vm1 = vmmov 0   ;;  %vm669_vm2 = vcmask 261120   ;;  %s3528_s0 = smov 116   ;;  %v740_v20 = vlaneseq }
  0x3f   : > { %3147 = vmatprep.subr.bf16.mxu0 %v3526_v2  ;;  %3167 = vmatprep.subr.bf16.mxu1 %v3526_v2  ;;  %v651_v4 = vld [vmem:[%s3752_s26] sm:$0xff]  ;;  %s3529_s2 = smov 124   ;;  %s3530_s29 = smov 112   ;;  %v3536_v18 = vmov 1983009808   ;;  %v3538_v52 = vmov 0  }
  0x40   : > { %3148 = vmatpush3.bf16.msra.mxu0 %v3379_v1  ;;  %3151 = vmatprep.mubr.msk.bf16.mxu0 %vm3527_vm1, %v3526_v2  ;;  %v652_v5 = vpack.c.bf16 %v651_v4, %v651_v4  ;;  %s3531_s14 = smov 120   ;;  %s3532_s17 = smov 104   ;;  %v738_v19 = vunpack.c.l.s4 %v3536_v18  ;;  %v741_v22 = vshrl.u32 %v740_v20, 7  ;;  %v3537_v25 = vmov 1934713408  }
  0x41   : > { %3149 = vmatprep.subr.bf16.mxu0 %v3526_v2  ;;  %3169 = vmatprep.mubr.msk.bf16.mxu1 %vm3527_vm1, %v3526_v2  ;;  %s3533_s28 = smov 108   ;;  %s3534_s18 = smov 96   ;;  %v755_v26 = vunpack.c.l.s4 %v3537_v25  ;;  %vm1361_vm3 = vcmask 31744   ;;  %vm1730_vm4 = vcmask 64512   ;;  %vm1830_vm5 = vcmask 1043456  }
  0x42   : > { %s3535_s19 = smov 100   ;;  %v739_v21 = vunpack.c.0.s8 %v738_v19  ;;  %s3540_s23 = smov 8   ;;  %vm2498_vm6 = vcmask 97280   ;;  %vm2500_vm7 = vcmask 130048   ;;  %vm2502_vm8 = vcmask 162816  }
  0x43   : > { %v756_v33 = vunpack.c.0.s8 %v755_v26  ;;  %s3541_s16 = smov 4   ;;  %s3542_s22 = smov 12   ;;  %vm2504_vm9 = vcmask 195584   ;;  %vm2506_vm10 = vcmask 228352  }
  0x44   : > { %3150 = vmatpush3.bf16.msra.mxu0 %v3380_v3  ;;  %v3801_v24 = vsub.s32 %v739_v21, %v741_v22  ;;  %s3544_s21 = smov 16   ;;  %s3545_s25 = smov 28  }
  0x45   : > { %3155 = vmatprep.subr.bf16.mxu0 %v3526_v2  ;;  %v3813_v41 = vsub.s32 %v756_v33, %v741_v22  ;;  %s3546_s20 = smov 24  }
  0x47   : > { %3152 = vmatmul.mubr.msk.bf16.vlgmr.msra.gmra.mrb[0].mxu0 %vm669_vm2, %v652_v5 }
  0x48   : > { %3157 = vmatprep.mubr.msk.bf16.mxu0 %vm3527_vm1, %v3526_v2 }
 0x11a   : > { %v707_v6 = vpop.f32.mrb[0].mxu0 }
 0x11b   : > { %v3768_v7 = vpack.c.bf16 %v707_v6, %v707_v6  ;;  %v3153_v8 = vpop.f32.mrb[1].mxu0 }
 0x11c   : > { %v710_v9 = vpop.f32.mrb[2].mxu0 }
 0x11d   : > { %721 = vrot.lane.b32.xlu1 %v3768_v7, %s3528_s0  ;;  %715 = vrot.lane.b32.xlu0 %v3768_v7, %s3529_s2  ;;  %v3154_v10 = vpop.f32.mrb[3].mxu0 }
 0x121   : > { %724 = vrot.lane.b32.xlu1 %v3768_v7, %s3530_s29  ;;  %718 = vrot.lane.b32.xlu0 %v3768_v7, %s3531_s14  ;;  %s4276_s29 = scalar_lea.vmem %s4222_s4, %s3694_s30 }
 0x125   : > { %730 = vrot.lane.b32.xlu1 %v3768_v7, %s3532_s17  ;;  %727 = vrot.lane.b32.xlu0 %v3768_v7, %s3533_s28  ;;  %s4277_s17 = scalar_lea.vmem %s4223_s5, %s3694_s30 }
 0x129   : > { %928 = vrot.lane.b32.xlu1 %v3768_v7, %s3534_s18  ;;  %733 = vrot.lane.b32.xlu0 %v3768_v7, %s3535_s19  ;;  %s4278_s19 = scalar_lea.vmem %s4224_s6, %s3694_s30 }
 0x18f   : > { %v3778_v11 = vpop.permute.xlu1 %721  ;;  %v3780_v12 = vpop.permute.xlu0 %715 }
 0x190   : > { %930 = vrot.lane.b32.xlu0 %v3780_v12, %s3534_s18 }
 0x193   : > { %v3783_v13 = vpop.permute.xlu0 %718  ;;  %v3787_v14 = vpop.permute.xlu1 %724 }
 0x194   : > { %934 = vrot.lane.b32.xlu0 %v3778_v11, %s3534_s18  ;;  %932 = vrot.lane.b32.xlu1 %v3783_v13, %s3534_s18  ;;  %v736_v29 = vcombine.low %v3768_v7, %v3787_v14 }
 0x196   : > { %v743_v36 = vrot.slane %v736_v29, %v3801_v24 }
 0x197   : > { %v3789_v15 = vpop.permute.xlu0 %727  ;;  %v3793_v16 = vpop.permute.xlu1 %730 }
 0x198   : > { %936 = vrot.lane.b32.xlu1 %v3787_v14, %s3534_s18  ;;  %938 = vrot.lane.b32.xlu0 %v3789_v15, %s3534_s18  ;;  %v744_v27 = vcombine.low %v3783_v13, %v3793_v16  ;;  %v770_v28 = vcombine.low %v3780_v12, %v3789_v15 }
 0x19a   : > { %v751_v34 = vrot.slane %v744_v27, %v3801_v24  ;;  %v777_v35 = vrot.slane %v770_v28, %v3801_v24 }
 0x19b   : > { %v3795_v17 = vpop.permute.xlu0 %733  ;;  %v929_v30 = vpop.permute.xlu1 %928 }
 0x19c   : > { %940 = vrot.lane.b32.xlu1 %v3793_v16, %s3534_s18  ;;  %942 = vrot.lane.b32.xlu0 %v3795_v17, %s3534_s18  ;;  %v778_v23 = vcombine.low %v3778_v11, %v3795_v17  ;;  %v752_v42 = vcombine.low %v743_v36, %v751_v34  ;;  %v753_v43 = vcombine.high %v743_v36, %v751_v34 }
 0x19e   : > { %v785_v31 = vrot.slane %v778_v23, %v3801_v24  ;;  %v3822_v48 = vrot.slane %v752_v42, %v3813_v41  ;;  %v3825_v49 = vrot.slane %v753_v43, %v3813_v41 }
 0x1a0   : > { %v786_v37 = vcombine.low %v777_v35, %v785_v31  ;;  %v787_v38 = vcombine.high %v777_v35, %v785_v31  ;;  %v768_v59 = vcombine.high %v3822_v48, %v3538_v52  ;;  %v769_v60 = vcombine.high %v3825_v49, %v3538_v52 }
 0x1a1   : > { %v808_v61 = vshrl.u32 %v3822_v48, 16  ;;  %v824_v4 = vshrl.u32 %v3825_v49, 16 }
 0x1a2   : > { %v3816_v44 = vrot.slane %v786_v37, %v3813_v41  ;;  %v3819_v45 = vrot.slane %v787_v38, %v3813_v41  ;;  %v816_v20 = vshrl.u32 %v768_v59, 16  ;;  %v832_v21 = vshrl.u32 %v769_v60, 16 }
 0x1a4   : > { %v802_v53 = vcombine.high %v3816_v44, %v3538_v52  ;;  %v803_v54 = vcombine.high %v3819_v45, %v3538_v52  ;;  %v809_v62 = vshrl.u32 %v3816_v44, 16  ;;  %v825_v6 = vshrl.u32 %v3819_v45, 16 }
 0x1a6   : > { %v817_v5 = vshrl.u32 %v802_v53, 16  ;;  %v833_v8 = vshrl.u32 %v803_v54, 16  ;;  %v810_v22 = vpack.i.b16 %v809_v62, %v808_v61  ;;  %v814_v23 = vpack.i.b16 %v802_v53, %v768_v59 }
 0x1a7   : > { %v830_v31 = vpack.i.b16 %v803_v54, %v769_v60  ;;  %v822_v59 = vpack.i.b16 %v3819_v45, %v3825_v49 }
 0x1a8   : > { %v818_v29 = vpack.i.b16 %v817_v5, %v816_v20 }
 0x202   : > { %v931_v32 = vpop.permute.xlu0 %930 }
 0x206   : > { %v933_v39 = vpop.permute.xlu1 %932  ;;  %v935_v40 = vpop.permute.xlu0 %934 }
 0x20a   : > { %v937_v46 = vpop.permute.xlu1 %936  ;;  %v939_v47 = vpop.permute.xlu0 %938 }
 0x20b   : > { %v952_v50 = vcombine.low %v929_v30, %v937_v46  ;;  %v986_v51 = vcombine.low %v931_v32, %v939_v47  ;;  %v826_v30 = vpack.i.b16 %v825_v6, %v824_v4  ;;  %v834_v32 = vpack.i.b16 %v833_v8, %v832_v21 }
 0x20d   : > { %v959_v63 = vrot.slane %v952_v50, %v3801_v24  ;;  %v993_v0 = vrot.slane %v986_v51, %v3801_v24  ;;  %v878_v60 = vcombine.low %v818_v29, %v834_v32 }
 0x20e   : > { %v941_v55 = vpop.permute.xlu1 %940  ;;  %v943_v56 = vpop.permute.xlu0 %942 }
 0x20f   : > { %v960_v57 = vcombine.low %v933_v39, %v941_v55  ;;  %v994_v58 = vcombine.low %v935_v40, %v943_v56  ;;  %v806_v55 = vpack.i.b16 %v3816_v44, %v3822_v48  ;;  %v885_v48 = vrot.slane %v878_v60, %v3801_v24 }
 0x211   : > { %v967_v1 = vrot.slane %v960_v57, %v3801_v24  ;;  %v1001_v3 = vrot.slane %v994_v58, %v3801_v24  ;;  %v836_v8 = vcombine.low %v806_v55, %v822_v59 }
 0x213   : > { %v968_v9 = vcombine.low %v959_v63, %v967_v1  ;;  %v969_v10 = vcombine.high %v959_v63, %v967_v1  ;;  %v1002_v18 = vcombine.low %v993_v0, %v1001_v3  ;;  %v1003_v19 = vcombine.high %v993_v0, %v1001_v3 }
 0x214   : > { %v844_v1 = vcombine.low %v814_v23, %v830_v31  ;;  %v870_v3 = vcombine.low %v810_v22, %v826_v30  ;;  %v843_v20 = vrot.slane %v836_v8, %v3801_v24 }
 0x215   : > { %v976_v25 = vrot.slane %v968_v9, %v3813_v41  ;;  %v983_v26 = vrot.slane %v969_v10, %v3813_v41  ;;  %v1010_v27 = vrot.slane %v1002_v18, %v3813_v41  ;;  %v1017_v28 = vrot.slane %v1003_v19, %v3813_v41 }
 0x216   : > { %v851_v49 = vrot.slane %v844_v1, %v3801_v24  ;;  %v877_v10 = vrot.slane %v870_v3, %v3801_v24 }
 0x217   : > { %v984_v33 = vcombine.high %v976_v25, %v3538_v52  ;;  %v985_v34 = vcombine.high %v983_v26, %v3538_v52  ;;  %v1024_v35 = vshrl.u32 %v976_v25, 16  ;;  %v1040_v36 = vshrl.u32 %v983_v26, 16 }
 0x218   : > { %v1018_v37 = vcombine.high %v1010_v27, %v3538_v52  ;;  %v1019_v38 = vcombine.high %v1017_v28, %v3538_v52  ;;  %v1022_v39 = vpack.i.b16 %v1010_v27, %v976_v25  ;;  %v1025_v40 = vshrl.u32 %v1010_v27, 16 }
 0x219   : > { %v1032_v42 = vshrl.u32 %v984_v33, 16  ;;  %v1048_v43 = vshrl.u32 %v985_v34, 16  ;;  %v1038_v46 = vpack.i.b16 %v1017_v28, %v983_v26  ;;  %v1041_v47 = vshrl.u32 %v1017_v28, 16 }
 0x21a   : > { %v1026_v50 = vpack.i.b16 %v1025_v40, %v1024_v35  ;;  %v1030_v51 = vpack.i.b16 %v1018_v37, %v984_v33  ;;  %v1033_v53 = vshrl.u32 %v1018_v37, 16  ;;  %v1046_v54 = vpack.i.b16 %v1019_v38, %v985_v34 }
 0x21b   : > { %v1042_v56 = vpack.i.b16 %v1041_v47, %v1040_v36  ;;  %v1049_v57 = vshrl.u32 %v1019_v38, 16  ;;  %v1052_v58 = vcombine.low %v1022_v39, %v1038_v46  ;;  %v886_v21 = vcombine.low %v877_v10, %v885_v48 }
 0x21c   : > { %v1034_v61 = vpack.i.b16 %v1033_v53, %v1032_v42  ;;  %v1060_v62 = vcombine.low %v1030_v51, %v1046_v54  ;;  %v852_v23 = vcombine.low %v843_v20, %v851_v49  ;;  %v887_v53 = vcombine.high %v877_v10, %v885_v48 }
 0x21d   : > { %v1050_v63 = vpack.i.b16 %v1049_v57, %v1048_v43  ;;  %v1086_v0 = vcombine.low %v1026_v50, %v1042_v56  ;;  %v1059_v4 = vrot.slane %v1052_v58, %v3801_v24  ;;  %v894_v29 = vrot.slane %v886_v21, %v3813_v41 }
 0x21e   : > { %v1067_v5 = vrot.slane %v1060_v62, %v3801_v24  ;;  %v860_v35 = vrot.slane %v852_v23, %v3813_v41  ;;  %v853_v54 = vcombine.high %v843_v20, %v851_v49 }
 0x21f   : > { %v1094_v6 = vcombine.low %v1034_v61, %v1050_v63  ;;  %v1093_v9 = vrot.slane %v1086_v0, %v3801_v24  ;;  %v902_v39 = vcombine.high %v894_v29, %v3538_v52  ;;  %v908_v57 = vshrl.u32 %v894_v29, 16 }
 0x220   : > { %v1068_v44 = vcombine.low %v1059_v4, %v1067_v5  ;;  %v1069_v33 = vcombine.high %v1059_v4, %v1067_v5  ;;  %v906_v42 = vpack.i.b16 %v894_v29, %v860_v35  ;;  %v868_v43 = vcombine.high %v860_v35, %v3538_v52 }
 0x221   : > { %v1101_v45 = vrot.slane %v1094_v6, %v3801_v24  ;;  %v907_v59 = vshrl.u32 %v860_v35, 16  ;;  %v901_v61 = vrot.slane %v887_v53, %v3813_v41  ;;  %v867_v0 = vrot.slane %v853_v54, %v3813_v41 }
 0x222   : > { %v1076_v18 = vrot.slane %v1068_v44, %v3813_v41  ;;  %v1083_v40 = vrot.slane %v1069_v33, %v3813_v41  ;;  %v912_v51 = vpack.i.b16 %v902_v39, %v868_v43  ;;  %v914_v6 = vshrl.u32 %v902_v39, 16 }
 0x223   : > { %v1102_v19 = vcombine.low %v1093_v9, %v1101_v45  ;;  %v1103_v28 = vcombine.high %v1093_v9, %v1101_v45  ;;  %v909_v63 = vpack.i.b16 %v908_v57, %v907_v59  ;;  %v918_v4 = vpack.i.b16 %v901_v61, %v867_v0 }
 0x224   : > { %v1084_v26 = vcombine.high %v1076_v18, %v3538_v52  ;;  %v1123_v36 = vshrl.u32 %v1076_v18, 16  ;;  %v1085_v62 = vcombine.high %v1083_v40, %v3538_v52  ;;  %v1135_v44 = vshrl.u32 %v1083_v40, 16 }
 0x225   : > { %v1110_v22 = vrot.slane %v1102_v19, %v3813_v41  ;;  %v1117_v37 = vrot.slane %v1103_v28, %v3813_v41  ;;  %v913_v48 = vshrl.u32 %v868_v43, 16  ;;  %v903_v45 = vcombine.high %v901_v61, %v3538_v52 }
 0x226   : > { %v1129_v55 = vshrl.u32 %v1084_v26, 16  ;;  %v869_v10 = vcombine.high %v867_v0, %v3538_v52  ;;  %v920_v21 = vshrl.u32 %v901_v61, 16  ;;  %v919_v23 = vshrl.u32 %v867_v0, 16 }
 0x227   : > { %v1122_v25 = vpack.i.b16 %v1110_v22, %v1076_v18  ;;  %v1118_v27 = vcombine.high %v1110_v22, %v3538_v52  ;;  %v1124_v32 = vshrl.u32 %v1110_v22, 16  ;;  %v1134_v46 = vpack.i.b16 %v1117_v37, %v1083_v40 }
 0x228   : > { %v1119_v58 = vcombine.high %v1117_v37, %v3538_v52  ;;  %v1136_v5 = vshrl.u32 %v1117_v37, 16  ;;  %v915_v49 = vpack.i.b16 %v914_v6, %v913_v48  ;;  %v924_v19 = vpack.i.b16 %v903_v45, %v869_v10 }
 0x229   : > { %v1366_v30 = vsel %vm1361_vm3, %v1122_v25, 0  ;;  %v1128_v31 = vpack.i.b16 %v1118_v27, %v1084_v26  ;;  %v1125_v38 = vpack.i.b16 %v1124_v32, %v1123_v36  ;;  %v1130_v47 = vshrl.u32 %v1118_v27, 16 }
 0x22a   : > { %3156 = vmatpush3.bf16.xpose.msra.mxu0 %v1366_v30  ;;  %v1550_v56 = vsel %vm1361_vm3, %v1134_v46, 0  ;;  %v1140_v1 = vpack.i.b16 %v1119_v58, %v1085_v62  ;;  %v1137_v9 = vpack.i.b16 %v1136_v5, %v1135_v44  ;;  %v1142_v20 = vshrl.u32 %v1119_v58, 16 }
 0x22b   : > { %v1458_v34 = vsel %vm1361_vm3, %v1128_v31, 0  ;;  %3161 = vmatprep.subr.bf16.mxu0 %v3526_v2  ;;  %v1412_v50 = vsel %vm1361_vm3, %v1125_v38, 0  ;;  %v1131_v60 = vpack.i.b16 %v1130_v47, %v1129_v55  ;;  %v1141_v22 = vshrl.u32 %v1085_v62, 16  ;;  %v1360_v31 = vld [vmem:[%s3702_s27] sm:$0xff]  ;;  %s3539_s27 = smov 64  }
 0x22c   : > { %3168 = vmatpush3.bf16.xpose.msra.mxu1 %v1458_v34  ;;  %v1642_v8 = vsel %vm1361_vm3, %v1140_v1, 0  ;;  %v1596_v18 = vsel %vm1361_vm3, %v1137_v9, 0  ;;  %v921_v26 = vpack.i.b16 %v920_v21, %v919_v23  ;;  %v926_v28 = vshrl.u32 %v903_v45, 16 }
 0x22d   : > { %3179 = vmatprep.subr.bf16.mxu1 %v3526_v2  ;;  %v1504_v3 = vsel %vm1361_vm3, %v1131_v60, 0  ;;  %v1143_v25 = vpack.i.b16 %v1142_v20, %v1141_v22  ;;  %v925_v29 = vshrl.u32 %v869_v10, 16 }
 0x22f   : > { %v1688_v27 = vsel %vm1361_vm3, %v1143_v25, 0  ;;  %v927_v30 = vpack.i.b16 %v926_v28, %v925_v29 }
 0x231   : > { %3158 = vmatmul.mubr.msk.bf16.vlgmr.msra.gmra.mrb[4].mxu0 %vm1361_vm3, %v906_v42 }
 0x232   : > { %3162 = vmatpush3.bf16.xpose.msra.mxu0 %v1412_v50  ;;  %3163 = vmatprep.mubr.msk.bf16.mxu0 %vm3527_vm1, %v3526_v2 }
 0x233   : > { %3170 = vmatmul.mubr.msk.bf16.vlgmr.msra.gmra.mrb[0].mxu1 %vm1361_vm3, %v912_v51  ;;  %3173 = vmatprep.subr.bf16.mxu0 %v3526_v2 }
 0x234   : > { %3180 = vmatpush3.bf16.xpose.msra.mxu1 %v1550_v56  ;;  %3181 = vmatprep.mubr.msk.bf16.mxu1 %vm3527_vm1, %v3526_v2 }
 0x235   : > { %3191 = vmatprep.subr.bf16.mxu1 %v3526_v2 }
 0x239   : > { %3164 = vmatmul.mubr.msk.bf16.vlgmr.msra.gmra.mrb[8].mxu0 %vm1361_vm3, %v909_v63 }
 0x23a   : > { %3174 = vmatpush3.bf16.xpose.msra.mxu0 %v1504_v3  ;;  %3175 = vmatprep.mubr.msk.bf16.mxu0 %vm3527_vm1, %v3526_v2 }
 0x23b   : > { %3182 = vmatmul.mubr.msk.bf16.vlgmr.msra.gmra.mrb[4].mxu1 %vm1361_vm3, %v918_v4  ;;  %3185 = vmatprep.subr.bf16.mxu0 %v3526_v2 }
 0x23c   : > { %3192 = vmatpush3.bf16.xpose.msra.mxu1 %v1642_v8  ;;  %3193 = vmatprep.mubr.msk.bf16.mxu1 %vm3527_vm1, %v3526_v2 }
 0x23d   : > { %3203 = vmatprep.subr.bf16.mxu1 %v3526_v2 }
 0x241   : > { %3176 = vmatmul.mubr.msk.bf16.vlgmr.msra.gmra.mrb[12].mxu0 %vm1361_vm3, %v915_v49 }
 0x242   : > { %3186 = vmatpush3.bf16.xpose.msra.mxu0 %v1596_v18  ;;  %3187 = vmatprep.mubr.msk.bf16.mxu0 %vm3527_vm1, %v3526_v2 }
 0x243   : > { %3194 = vmatmul.mubr.msk.bf16.vlgmr.msra.gmra.mrb[8].mxu1 %vm1361_vm3, %v924_v19  ;;  %3197 = vmatprep.subr.bf16.mxu0 %v3526_v2 }
 0x244   : > { %3205 = vmatprep.mubr.msk.bf16.mxu1 %vm3527_vm1, %v3526_v2 }
 0x249   : > { %3188 = vmatmul.mubr.msk.bf16.vlgmr.msra.gmra.mrb[16].mxu0 %vm1361_vm3, %v921_v26 }
 0x24a   : > { %3198 = vmatpush3.bf16.xpose.msra.mxu0 %v1688_v27  ;;  %3199 = vmatprep.mubr.msk.bf16.mxu0 %vm3527_vm1, %v3526_v2 }
 0x24b   : > { %3209 = vmatprep.subr.bf16.mxu0 %v3526_v2 }
 0x251   : > { %3200 = vmatmul.mubr.msk.bf16.vlgmr.msra.gmra.mrb[20].mxu0 %vm1361_vm3, %v927_v30 }
 0x252   : > { %3211 = vmatprep.mubr.msk.bf16.mxu0 %vm3527_vm1, %v3526_v2 }
 0x304   : > { %v1402_v32 = vpop.f32.mrb[4].mxu0 }
 0x305   : > { %v3920_v33 = vadd.f32 %v1402_v32, %v1360_v31  ;;  %v3159_v34 = vpop.f32.mrb[5].mxu0 }
 0x306   : > { %v1405_v35 = vpop.f32.mrb[6].mxu0  ;;  %v1494_v36 = vpop.f32.mrb[0].mxu1 }
 0x307   : > { %v3160_v37 = vpop.f32.mrb[7].mxu0  ;;  %v3171_v38 = vpop.f32.mrb[1].mxu1  ;;  %v1731_v39 = vsel %vm1730_vm4, %v3920_v33, -inf  ;;  %v1495_v53 = vadd.f32 %v1494_v36, %v1360_v31 }
 0x308   : > { %v1497_v40 = vpop.f32.mrb[2].mxu1  ;;  %1732 = vmax.xlane.f32.xlu1 %v1731_v39 }
 0x309   : > { %v3172_v42 = vpop.f32.mrb[3].mxu1  ;;  %v1737_v60 = vsel %vm1730_vm4, %v1495_v53, -inf }
 0x30c   : > { %v1448_v43 = vpop.f32.mrb[8].mxu0 }
 0x30d   : > { %v1449_v46 = vadd.f32 %v1448_v43, %v1360_v31  ;;  %v3165_v47 = vpop.f32.mrb[9].mxu0 }
 0x30e   : > { %v1451_v50 = vpop.f32.mrb[10].mxu0  ;;  %v1586_v51 = vpop.f32.mrb[4].mxu1 }
 0x30f   : > { %v3166_v54 = vpop.f32.mrb[11].mxu0  ;;  %v3183_v55 = vpop.f32.mrb[5].mxu1  ;;  %v1734_v56 = vsel %vm1730_vm4, %v1449_v46, -inf  ;;  %v1587_v59 = vadd.f32 %v1586_v51, %v1360_v31 }
 0x310   : > { %v1589_v57 = vpop.f32.mrb[6].mxu1  ;;  %1735 = vmax.xlane.f32.xlu0 %v1734_v56 }
 0x311   : > { %v3184_v58 = vpop.f32.mrb[7].mxu1  ;;  %v1743_v6 = vsel %vm1730_vm4, %v1587_v59, -inf }
 0x314   : > { %1738 = vmax.xlane.f32.xlu0 %v1737_v60  ;;  %v1540_v61 = vpop.f32.mrb[12].mxu0 }
 0x315   : > { %v1541_v62 = vadd.f32 %v1540_v61, %v1360_v31  ;;  %v3177_v63 = vpop.f32.mrb[13].mxu0 }
 0x316   : > { %v1543_v0 = vpop.f32.mrb[14].mxu0  ;;  %v1678_v1 = vpop.f32.mrb[8].mxu1 }
 0x317   : > { %v1679_v3 = vadd.f32 %v1678_v1, %v1360_v31  ;;  %v3178_v4 = vpop.f32.mrb[15].mxu0  ;;  %v3195_v5 = vpop.f32.mrb[9].mxu1  ;;  %v1740_v8 = vsel %vm1730_vm4, %v1541_v62, -inf }
 0x318   : > { %v1681_v44 = vpop.f32.mrb[10].mxu1  ;;  %1744 = vmax.xlane.f32.xlu0 %v1743_v6  ;;  %1741 = vmax.xlane.f32.xlu1 %v1740_v8 }
 0x319   : > { %v3196_v48 = vpop.f32.mrb[11].mxu1  ;;  %v1749_v9 = vsel %vm1730_vm4, %v1679_v3, -inf }
 0x31c   : > { %1750 = vmax.xlane.f32.xlu0 %v1749_v9  ;;  %v1632_v45 = vpop.f32.mrb[16].mxu0 }
 0x31d   : > { %v1633_v49 = vadd.f32 %v1632_v45, %v1360_v31  ;;  %v3189_v10 = vpop.f32.mrb[17].mxu0 }
 0x31e   : > { %v1635_v18 = vpop.f32.mrb[18].mxu0 }
 0x31f   : > { %v3190_v19 = vpop.f32.mrb[19].mxu0  ;;  %v1746_v20 = vsel %vm1730_vm4, %v1633_v49, -inf }
 0x320   : > { %1747 = vmax.xlane.f32.xlu1 %v1746_v20 }
 0x324   : > { %v1724_v21 = vpop.f32.mrb[20].mxu0 }
 0x325   : > { %v3930_v22 = vadd.f32 %v1724_v21, %v1360_v31  ;;  %v3201_v23 = vpop.f32.mrb[21].mxu0 }
 0x326   : > { %v1727_v25 = vpop.f32.mrb[22].mxu0 }
 0x327   : > { %v3202_v26 = vpop.f32.mrb[23].mxu0  ;;  %v1752_v27 = vsel %vm1730_vm4, %v3930_v22, -inf }
 0x328   : > { %1753 = vmax.xlane.f32.xlu1 %v1752_v27 }
 0x332   : > { %1144 = vrot.lane.b32.xlu0 %v3768_v7, %s3539_s27 }
 0x336   : > { %1150 = vrot.lane.b32.xlu0 %v3778_v11, %s3539_s27 }
 0x339   : > { %1146 = vrot.lane.b32.xlu1 %v3780_v12, %s3539_s27 }
 0x33a   : > { %1154 = vrot.lane.b32.xlu0 %v3789_v15, %s3539_s27 }
 0x33d   : > { %1148 = vrot.lane.b32.xlu1 %v3783_v13, %s3539_s27 }
 0x33e   : > { %1158 = vrot.lane.b32.xlu0 %v3795_v17, %s3539_s27 }
 0x341   : > { %1152 = vrot.lane.b32.xlu1 %v3787_v14, %s3539_s27 }
 0x345   : > { %1156 = vrot.lane.b32.xlu1 %v3793_v16, %s3539_s27 }
 0x395   : > { %v1733_v28 = vpop.xlane.xlu1 %1732 }
 0x396   : > { %v1755_v29 = vsub.f32 %v3920_v33, %v1733_v28 }
 0x398   : > { %v1763_v30 = vmul.f32 1.442695, %v1755_v29 }
 0x39a   : > { %3393 = vpow2.f32 %v1763_v30 }
 0x39d   : > { %v1736_v7 = vpop.xlane.xlu0 %1735 }
 0x39e   : > { %v1756_v31 = vsub.f32 %v1449_v46, %v1736_v7 }
 0x3a0   : > { %v1765_v11 = vmul.f32 1.442695, %v1756_v31 }
 0x3a1   : > { %v1739_v32 = vpop.xlane.xlu0 %1738 }
 0x3a2   : > { %3395 = vpow2.f32 %v1765_v11  ;;  %v1757_v12 = vsub.f32 %v1495_v53, %v1739_v32 }
 0x3a4   : > { %v3943_v15 = vpop.eup %3393  ;;  %v1767_v13 = vmul.f32 1.442695, %v1757_v12 }
 0x3a5   : > { %v1745_v34 = vpop.xlane.xlu0 %1744  ;;  %v1742_v17 = vpop.xlane.xlu1 %1741  ;;  %v1779_v14 = vsel %vm1730_vm4, %v3943_v15, 0.0 }
 0x3a6   : > { %3397 = vpow2.f32 %v1767_v13  ;;  %v1759_v16 = vsub.f32 %v1587_v59, %v1745_v34  ;;  %v1758_v35 = vsub.f32 %v1541_v62, %v1742_v17  ;;  %1780 = vadd.xlane.f32.xlu1 %v1779_v14 }
 0x3a8   : > { %v1771_v33 = vmul.f32 1.442695, %v1759_v16  ;;  %v1769_v36 = vmul.f32 1.442695, %v1758_v35 }
 0x3a9   : > { %v1751_v37 = vpop.xlane.xlu0 %1750 }
 0x3aa   : > { %3399 = vpow2.f32 %v1771_v33  ;;  %v1761_v38 = vsub.f32 %v1679_v3, %v1751_v37 }
 0x3ab   : > { %3401 = vpow2.f32 %v1769_v36 }
 0x3ac   : > { %v3947_v39 = vpop.eup %3395  ;;  %v1775_v40 = vmul.f32 1.442695, %v1761_v38 }
 0x3ad   : > { %v1145_v42 = vpop.permute.xlu0 %1144  ;;  %v1748_v43 = vpop.xlane.xlu1 %1747  ;;  %v1782_v46 = vsel %vm1730_vm4, %v3947_v39, 0.0 }
 0x3ae   : > { %3403 = vpow2.f32 %v1775_v40  ;;  %v1760_v47 = vsub.f32 %v1633_v49, %v1748_v43  ;;  %1783 = vadd.xlane.f32.xlu0 %v1782_v46 }
 0x3b0   : > { %v3951_v50 = vpop.eup %3397  ;;  %v1773_v51 = vmul.f32 1.442695, %v1760_v47 }
 0x3b1   : > { %v1151_v53 = vpop.permute.xlu0 %1150  ;;  %v1785_v54 = vsel %vm1730_vm4, %v3951_v50, 0.0 }
 0x3b2   : > { %3405 = vpow2.f32 %v1773_v51  ;;  %1786 = vadd.xlane.f32.xlu0 %v1785_v54 }
 0x3b4   : > { %v3955_v55 = vpop.eup %3399 }
 0x3b5   : > { %v3957_v56 = vpop.eup %3401  ;;  %v1155_v57 = vpop.permute.xlu0 %1154  ;;  %v1791_v59 = vsel %vm1730_vm4, %v3955_v55, 0.0 }
 0x3b6   : > { %v1754_v58 = vpop.xlane.xlu1 %1753  ;;  %1792 = vadd.xlane.f32.xlu0 %v1791_v59  ;;  %v1788_v61 = vsel %vm1730_vm4, %v3957_v56, 0.0 }
 0x3b7   : > { %v1762_v60 = vsub.f32 %v3930_v22, %v1754_v58  ;;  %1789 = vadd.xlane.f32.xlu1 %v1788_v61 }
 0x3b8   : > { %v3964_v62 = vpop.eup %3403 }
 0x3b9   : > { %v1777_v63 = vmul.f32 1.442695, %v1762_v60  ;;  %v1159_v0 = vpop.permute.xlu0 %1158  ;;  %v1797_v3 = vsel %vm1730_vm4, %v3964_v62, 0.0 }
 0x3ba   : > { %v1147_v1 = vpop.permute.xlu1 %1146  ;;  %1798 = vadd.xlane.f32.xlu0 %v1797_v3  ;;  %v1210_v4 = vcombine.low %v1151_v53, %v1159_v0 }
 0x3bb   : > { %3407 = vpow2.f32 %v1777_v63  ;;  %v1202_v5 = vcombine.low %v1147_v1, %v1155_v57 }
 0x3bc   : > { %v3968_v6 = vpop.eup %3405  ;;  %v1217_v48 = vrot.slane %v1210_v4, %v3801_v24 }
 0x3bd   : > { %v1794_v44 = vsel %vm1730_vm4, %v3968_v6, 0.0  ;;  %v1209_v9 = vrot.slane %v1202_v5, %v3801_v24 }
 0x3be   : > { %v1149_v8 = vpop.permute.xlu1 %1148  ;;  %1795 = vadd.xlane.f32.xlu1 %v1794_v44 }
 0x3bf   : > { %v1218_v49 = vcombine.low %v1209_v9, %v1217_v48  ;;  %v1219_v19 = vcombine.high %v1209_v9, %v1217_v48 }
 0x3c1   : > { %v1226_v23 = vrot.slane %v1218_v49, %v3813_v41  ;;  %v1233_v27 = vrot.slane %v1219_v19, %v3813_v41 }
 0x3c2   : > { %v1153_v45 = vpop.permute.xlu1 %1152 }
 0x3c3   : > { %v1168_v18 = vcombine.low %v1145_v42, %v1153_v45  ;;  %v1234_v30 = vcombine.high %v1226_v23, %v3538_v52  ;;  %v1235_v11 = vcombine.high %v1233_v27, %v3538_v52  ;;  %v1241_v32 = vshrl.u32 %v1226_v23, 16 }
 0x3c4   : > { %v1257_v16 = vshrl.u32 %v1233_v27, 16 }
 0x3c5   : > { %v3974_v10 = vpop.eup %3407  ;;  %v1175_v25 = vrot.slane %v1168_v18, %v3801_v24  ;;  %v1249_v14 = vshrl.u32 %v1234_v30, 16  ;;  %v1265_v42 = vshrl.u32 %v1235_v11, 16 }
 0x3c6   : > { %v1157_v20 = vpop.permute.xlu1 %1156  ;;  %v1800_v21 = vsel %vm1730_vm4, %v3974_v10, 0.0 }
 0x3c7   : > { %v1176_v22 = vcombine.low %v1149_v8, %v1157_v20  ;;  %1801 = vadd.xlane.f32.xlu1 %v1800_v21 }
 0x3c9   : > { %v1183_v26 = vrot.slane %v1176_v22, %v3801_v24 }
 0x3cb   : > { %v1184_v28 = vcombine.low %v1175_v25, %v1183_v26  ;;  %v1185_v29 = vcombine.high %v1175_v25, %v1183_v26 }
 0x3cd   : > { %v1192_v7 = vrot.slane %v1184_v28, %v3813_v41  ;;  %v1199_v31 = vrot.slane %v1185_v29, %v3813_v41 }
 0x3cf   : > { %v1200_v12 = vcombine.high %v1192_v7, %v3538_v52  ;;  %v1201_v13 = vcombine.high %v1199_v31, %v3538_v52  ;;  %v1238_v34 = vpack.i.b16 %v1226_v23, %v1192_v7  ;;  %v1240_v17 = vshrl.u32 %v1192_v7, 16 }
 0x3d0   : > { %v1254_v35 = vpack.i.b16 %v1233_v27, %v1199_v31  ;;  %v1256_v33 = vshrl.u32 %v1199_v31, 16 }
 0x3d1   : > { %v1242_v36 = vpack.i.b16 %v1241_v32, %v1240_v17  ;;  %v1246_v37 = vpack.i.b16 %v1234_v30, %v1200_v12  ;;  %v1248_v38 = vshrl.u32 %v1200_v12, 16  ;;  %v1262_v40 = vpack.i.b16 %v1235_v11, %v1201_v13 }
 0x3d2   : > { %v1258_v43 = vpack.i.b16 %v1257_v16, %v1256_v33  ;;  %v1264_v46 = vshrl.u32 %v1201_v13, 16  ;;  %v1268_v47 = vcombine.low %v1238_v34, %v1254_v35 }
 0x3d3   : > { %v1250_v51 = vpack.i.b16 %v1249_v14, %v1248_v38  ;;  %v1276_v53 = vcombine.low %v1246_v37, %v1262_v40 }
 0x3d4   : > { %v1266_v54 = vpack.i.b16 %v1265_v42, %v1264_v46  ;;  %v1302_v57 = vcombine.low %v1242_v36, %v1258_v43  ;;  %v1275_v58 = vrot.slane %v1268_v47, %v3801_v24 }
 0x3d5   : > { %v1283_v59 = vrot.slane %v1276_v53, %v3801_v24 }
 0x3d6   : > { %v1310_v60 = vcombine.low %v1250_v51, %v1266_v54  ;;  %v1309_v0 = vrot.slane %v1302_v57, %v3801_v24 }
 0x3d7   : > { %v1284_v61 = vcombine.low %v1275_v58, %v1283_v59  ;;  %v1285_v63 = vcombine.high %v1275_v58, %v1283_v59 }
 0x3d8   : > { %v1317_v1 = vrot.slane %v1310_v60, %v3801_v24 }
 0x3d9   : > { %v1292_v3 = vrot.slane %v1284_v61, %v3813_v41  ;;  %v1299_v4 = vrot.slane %v1285_v63, %v3813_v41 }
 0x3da   : > { %v1318_v5 = vcombine.low %v1309_v0, %v1317_v1  ;;  %v1319_v8 = vcombine.high %v1309_v0, %v1317_v1 }
 0x3db   : > { %v1300_v44 = vcombine.high %v1292_v3, %v3538_v52  ;;  %v1301_v48 = vcombine.high %v1299_v4, %v3538_v52  ;;  %v1339_v49 = vshrl.u32 %v1292_v3, 16  ;;  %v1351_v18 = vshrl.u32 %v1299_v4, 16 }
 0x3dc   : > { %v1326_v9 = vrot.slane %v1318_v5, %v3813_v41  ;;  %v1333_v45 = vrot.slane %v1319_v8, %v3813_v41 }
 0x3dd   : > { %v1345_v23 = vshrl.u32 %v1300_v44, 16  ;;  %v1357_v27 = vshrl.u32 %v1301_v48, 16 }
 0x3de   : > { %v1338_v19 = vpack.i.b16 %v1326_v9, %v1292_v3  ;;  %v1340_v20 = vshrl.u32 %v1326_v9, 16  ;;  %v1334_v21 = vcombine.high %v1326_v9, %v3538_v52  ;;  %v1350_v22 = vpack.i.b16 %v1333_v45, %v1299_v4 }
 0x3df   : > { %v1352_v25 = vshrl.u32 %v1333_v45, 16  ;;  %v1335_v26 = vcombine.high %v1333_v45, %v3538_v52 }
 0x3e0   : > { %v1832_v28 = vsel %vm1830_vm5, %v1338_v19, 0  ;;  %v1341_v29 = vpack.i.b16 %v1340_v20, %v1339_v49  ;;  %v1344_v30 = vpack.i.b16 %v1334_v21, %v1300_v44  ;;  %v1346_v7 = vshrl.u32 %v1334_v21, 16 }
 0x3e1   : > { %3204 = vmatpush3.bf16.msra.mxu1 %v1832_v28  ;;  %v2016_v31 = vsel %vm1830_vm5, %v1350_v22, 0  ;;  %v1353_v11 = vpack.i.b16 %v1352_v25, %v1351_v18  ;;  %v1356_v32 = vpack.i.b16 %v1335_v26, %v1301_v48  ;;  %v1358_v12 = vshrl.u32 %v1335_v26, 16 }
 0x3e2   : > { %v1878_v13 = vsel %vm1830_vm5, %v1341_v29, 0  ;;  %3215 = vmatprep.subr.bf16.mxu1 %v3526_v2  ;;  %v1924_v34 = vsel %vm1830_vm5, %v1344_v30, 0  ;;  %v1347_v17 = vpack.i.b16 %v1346_v7, %v1345_v23 }
 0x3e3   : > { %3210 = vmatpush3.bf16.msra.mxu0 %v1878_v13  ;;  %v2062_v52 = vsel %vm1830_vm5, %v1353_v11, 0  ;;  %v2108_v14 = vsel %vm1830_vm5, %v1356_v32, 0  ;;  %v1359_v16 = vpack.i.b16 %v1358_v12, %v1357_v27 }
 0x3e4   : > { %3221 = vmatprep.subr.bf16.mxu0 %v3526_v2  ;;  %v1970_v35 = vsel %vm1830_vm5, %v1347_v17, 0 }
 0x3e5   : > { %v2154_v33 = vsel %vm1830_vm5, %v1359_v16, 0 }
 0x433   : > { %v1781_v36 = vpop.xlane.xlu1 %1780 }
 0x434   : > { %3409 = vrcp.f32 %v1781_v36 }
 0x43b   : > { %v1784_v37 = vpop.xlane.xlu0 %1783 }
 0x43c   : > { %3411 = vrcp.f32 %v1784_v37 }
 0x43e   : > { %v3410_v38 = vpop.eup %3409 }
 0x43f   : > { %v1811_v40 = vmul.f32 %v3410_v38, %v3943_v15  ;;  %v1787_v42 = vpop.xlane.xlu0 %1786 }
 0x440   : > { %3413 = vrcp.f32 %v1787_v42 }
 0x441   : > { %v1819_v43 = vpack.c.bf16 %v1811_v40, %v1811_v40 }
 0x443   : > { %v1793_v46 = vpop.xlane.xlu0 %1792  ;;  %3206 = vmatmul.mubr.msk.bf16.vlgmr.msra.gmra.mrb[12].mxu1 %vm1730_vm4, %v1819_v43 }
 0x444   : > { %3415 = vrcp.f32 %v1793_v46  ;;  %3216 = vmatpush3.bf16.msra.mxu1 %v1924_v34  ;;  %v1790_v47 = vpop.xlane.xlu1 %1789  ;;  %3217 = vmatprep.mubr.msk.bf16.mxu1 %vm3527_vm1, %v3526_v2 }
 0x445   : > { %3417 = vrcp.f32 %v1790_v47  ;;  %3227 = vmatprep.subr.bf16.mxu1 %v3526_v2 }
 0x446   : > { %v3412_v51 = vpop.eup %3411 }
 0x447   : > { %v1812_v53 = vmul.f32 %v3412_v51, %v3947_v39  ;;  %v1799_v54 = vpop.xlane.xlu0 %1798 }
 0x448   : > { %3419 = vrcp.f32 %v1799_v54 }
 0x449   : > { %v1820_v15 = vpack.c.bf16 %v1812_v53, %v1812_v53 }
 0x44a   : > { %v3414_v57 = vpop.eup %3413 }
 0x44b   : > { %v1813_v58 = vmul.f32 %v3414_v57, %v3951_v50  ;;  %3212 = vmatmul.mubr.msk.bf16.vlgmr.msra.gmra.mrb[24].mxu0 %vm1730_vm4, %v1820_v15  ;;  %v1796_v59 = vpop.xlane.xlu1 %1795 }
 0x44c   : > { %3222 = vmatpush3.bf16.msra.mxu0 %v1970_v35  ;;  %3421 = vrcp.f32 %v1796_v59  ;;  %3223 = vmatprep.mubr.msk.bf16.mxu0 %vm3527_vm1, %v3526_v2 }
 0x44d   : > { %v1821_v60 = vpack.c.bf16 %v1813_v58, %v1813_v58  ;;  %3233 = vmatprep.subr.bf16.mxu0 %v3526_v2 }
 0x44e   : > { %v3416_v61 = vpop.eup %3415 }
 0x44f   : > { %v3418_v63 = vpop.eup %3417  ;;  %3218 = vmatmul.mubr.msk.bf16.vlgmr.msra.gmra.mrb[16].mxu1 %vm1730_vm4, %v1821_v60  ;;  %v1815_v50 = vmul.f32 %v3416_v61, %v3955_v55 }
 0x450   : > { %v1814_v39 = vmul.f32 %v3418_v63, %v3957_v56  ;;  %3228 = vmatpush3.bf16.msra.mxu1 %v2016_v31  ;;  %3229 = vmatprep.mubr.msk.bf16.mxu1 %vm3527_vm1, %v3526_v2 }
 0x451   : > { %3239 = vmatprep.subr.bf16.mxu1 %v3526_v2  ;;  %v1823_v4 = vpack.c.bf16 %v1815_v50, %v1815_v50 }
 0x452   : > { %v1822_v0 = vpack.c.bf16 %v1814_v39, %v1814_v39  ;;  %v3420_v3 = vpop.eup %3419 }
 0x453   : > { %v1817_v55 = vmul.f32 %v3420_v3, %v3964_v62 }
 0x454   : > { %v1802_v1 = vpop.xlane.xlu1 %1801  ;;  %3224 = vmatmul.mubr.msk.bf16.vlgmr.msra.gmra.mrb[28].mxu0 %vm1730_vm4, %v1822_v0 }
 0x455   : > { %3423 = vrcp.f32 %v1802_v1  ;;  %3234 = vmatpush3.bf16.msra.mxu0 %v2062_v52  ;;  %3235 = vmatprep.mubr.msk.bf16.mxu0 %vm3527_vm1, %v3526_v2  ;;  %v1825_v44 = vpack.c.bf16 %v1817_v55, %v1817_v55 }
 0x456   : > { %v3422_v56 = vpop.eup %3421  ;;  %3245 = vmatprep.subr.bf16.mxu0 %v3526_v2 }
 0x457   : > { %v1816_v5 = vmul.f32 %v3422_v56, %v3968_v6  ;;  %3230 = vmatmul.mubr.msk.bf16.vlgmr.msra.gmra.mrb[20].mxu1 %vm1730_vm4, %v1823_v4 }
 0x458   : > { %3240 = vmatpush3.bf16.msra.mxu1 %v2108_v14  ;;  %3241 = vmatprep.mubr.msk.bf16.mxu1 %vm3527_vm1, %v3526_v2 }
 0x459   : > { %v1824_v8 = vpack.c.bf16 %v1816_v5, %v1816_v5  ;;  %3251 = vmatprep.subr.bf16.mxu1 %v3526_v2 }
 0x45c   : > { %3236 = vmatmul.mubr.msk.bf16.vlgmr.msra.gmra.mrb[32].mxu0 %vm1730_vm4, %v1824_v8 }
 0x45d   : > { %3246 = vmatpush3.bf16.msra.mxu0 %v2154_v33  ;;  %3247 = vmatprep.mubr.msk.bf16.mxu0 %vm3527_vm1, %v3526_v2 }
 0x45e   : > { %3259 = vmatprep.subr.bf16.mxu0 %v3526_v2 }
 0x45f   : > { %v3424_v48 = vpop.eup %3423  ;;  %3242 = vmatmul.mubr.msk.bf16.vlgmr.msra.gmra.mrb[24].mxu1 %vm1730_vm4, %v1825_v44 }
 0x460   : > { %v1818_v6 = vmul.f32 %v3424_v48, %v3974_v10  ;;  %3255 = vmatprep.mubr.msk.bf16.mxu1 %vm3527_vm1, %v3526_v2 }
 0x462   : > { %v1826_v62 = vpack.c.bf16 %v1818_v6, %v1818_v6 }
 0x464   : > { %3248 = vmatmul.mubr.msk.bf16.vlgmr.msra.gmra.mrb[36].mxu0 %vm1730_vm4, %v1826_v62 }
 0x465   : > { %3263 = vmatprep.mubr.msk.bf16.mxu0 %vm3527_vm1, %v3526_v2 }
 0x516   : > { %v1868_v9 = vpop.f32.mrb[12].mxu1 }
 0x517   : > { %v3207_v45 = vpop.f32.mrb[13].mxu1 }
 0x518   : > { %v1871_v49 = vpop.f32.mrb[14].mxu1 }
 0x519   : > { %v3208_v18 = vpop.f32.mrb[15].mxu1 }
 0x51e   : > { %v1914_v19 = vpop.f32.mrb[24].mxu0 }
 0x51f   : > { %v3213_v20 = vpop.f32.mrb[25].mxu0 }
 0x520   : > { %v1917_v21 = vpop.f32.mrb[26].mxu0 }
 0x521   : > { %v3214_v22 = vpop.f32.mrb[27].mxu0 }
 0x522   : > { %v1960_v10 = vpop.f32.mrb[16].mxu1 }
 0x523   : > { %v2196_v23 = vcombine.low %v1868_v9, %v1960_v10  ;;  %v2197_v25 = vcombine.high %v1868_v9, %v1960_v10  ;;  %v3219_v26 = vpop.f32.mrb[17].mxu1 }
 0x524   : > { %v1963_v27 = vpop.f32.mrb[18].mxu1 }
 0x525   : > { %v3220_v28 = vpop.f32.mrb[19].mxu1  ;;  %v2204_v32 = vrot.slane %v2196_v23, %v3801_v24  ;;  %v2211_v12 = vrot.slane %v2197_v25, %v3801_v24 }
 0x527   : > { %v2006_v29 = vpop.f32.mrb[28].mxu0 }
 0x528   : > { %v2212_v30 = vcombine.low %v1914_v19, %v2006_v29  ;;  %v2213_v7 = vcombine.high %v1914_v19, %v2006_v29  ;;  %v3225_v31 = vpop.f32.mrb[29].mxu0 }
 0x529   : > { %v2009_v11 = vpop.f32.mrb[30].mxu0 }
 0x52a   : > { %v2220_v13 = vrot.slane %v2212_v30, %v3801_v24  ;;  %v2227_v34 = vrot.slane %v2213_v7, %v3801_v24  ;;  %v3226_v17 = vpop.f32.mrb[31].mxu0  ;;  %v2052_v52 = vpop.f32.mrb[20].mxu1 }
 0x52b   : > { %v3231_v14 = vpop.f32.mrb[21].mxu1 }
 0x52c   : > { %v2260_v16 = vcombine.low %v2204_v32, %v2220_v13  ;;  %v2261_v35 = vcombine.high %v2204_v32, %v2220_v13  ;;  %v2276_v33 = vcombine.low %v2211_v12, %v2227_v34  ;;  %v2277_v36 = vcombine.high %v2211_v12, %v2227_v34  ;;  %v2055_v37 = vpop.f32.mrb[22].mxu1  ;;  %v3381_v32 = vld [vmem:[%s3715_s12] sm:$0xff]  }
 0x52d   : > { %v3232_v38 = vpop.f32.mrb[23].mxu1  ;;  %3252 = vmatpush3.bf16.msra.mxu1 %v3381_v32 }
 0x52e   : > { %v2268_v40 = vrot.slane %v2260_v16, %v3813_v41  ;;  %v2275_v42 = vrot.slane %v2261_v35, %v3813_v41  ;;  %v2284_v43 = vrot.slane %v2276_v33, %v3813_v41  ;;  %v2291_v46 = vrot.slane %v2277_v36, %v3813_v41  ;;  %3253 = vmatprep.subr.bf16.mxu1 %v3526_v2  ;;  %v3382_v33 = vld [vmem:[%s3715_s12 + $0x8] sm:$0xff]   ;;  %s3543_s12 = smov 20  }
 0x52f   : > { %v2098_v47 = vpop.f32.mrb[32].mxu0 }
 0x530   : > { %v3060_v51 = vcombine.low %v2268_v40, %v2275_v42  ;;  %v3062_v53 = vcombine.high %v2268_v40, %v2275_v42  ;;  %v3064_v54 = vcombine.low %v2284_v43, %v2291_v46  ;;  %v3066_v15 = vcombine.high %v2284_v43, %v2291_v46  ;;  %v3237_v57 = vpop.f32.mrb[33].mxu0 }
 0x531   : > { %v2101_v58 = vpop.f32.mrb[34].mxu0  ;;  %3254 = vmatpush3.bf16.msra.mxu1 %v3382_v33 }
 0x532   : > { %v3238_v59 = vpop.f32.mrb[35].mxu0  ;;  %v2144_v60 = vpop.f32.mrb[24].mxu1  ;;  %v2340_v61 = vrot.slane %v3060_v51, %v3801_v24  ;;  %v2356_v63 = vrot.slane %v3062_v53, %v3801_v24  ;;  %v2372_v39 = vrot.slane %v3064_v54, %v3801_v24  ;;  %v2388_v50 = vrot.slane %v3066_v15, %v3801_v24  ;;  %3267 = vmatprep.subr.bf16.mxu1 %v3526_v2 }
 0x533   : > { %v2228_v0 = vcombine.low %v2052_v52, %v2144_v60  ;;  %v2229_v1 = vcombine.high %v2052_v52, %v2144_v60  ;;  %v3243_v3 = vpop.f32.mrb[25].mxu1 }
 0x534   : > { %v2147_v4 = vpop.f32.mrb[26].mxu1  ;;  %v2397_v56 = vcombine.high %v2340_v61, %v2356_v63  ;;  %v2429_v5 = vcombine.high %v2372_v39, %v2388_v50  ;;  %v2396_v55 = vcombine.low %v2340_v61, %v2356_v63  ;;  %v2428_v8 = vcombine.low %v2372_v39, %v2388_v50 }
 0x535   : > { %v3244_v44 = vpop.f32.mrb[27].mxu1  ;;  %v2236_v22 = vrot.slane %v2228_v0, %v3801_v24  ;;  %v2243_v26 = vrot.slane %v2229_v1, %v3801_v24 }
 0x536   : > { %v2411_v48 = vrot.slane %v2397_v56, %v3813_v41  ;;  %v2443_v6 = vrot.slane %v2429_v5, %v3813_v41  ;;  %v4063_v62 = vrot.slane %v2396_v55, %v3813_v41  ;;  %v4066_v9 = vrot.slane %v2428_v8, %v3813_v41 }
 0x537   : > { %v2190_v45 = vpop.f32.mrb[36].mxu0 }
 0x538   : > { %v2244_v49 = vcombine.low %v2098_v47, %v2190_v45  ;;  %v2245_v18 = vcombine.high %v2098_v47, %v2190_v45  ;;  %v3249_v19 = vpop.f32.mrb[37].mxu0  ;;  %v2462_v20 = vcombine.low %v2411_v48, %v2443_v6  ;;  %v2461_v21 = vcombine.high %v4063_v62, %v4066_v9 }
 0x539   : > { %v2193_v10 = vpop.f32.mrb[38].mxu0  ;;  %v2463_v23 = vcombine.high %v2411_v48, %v2443_v6  ;;  %v2460_v25 = vcombine.low %v4063_v62, %v4066_v9  ;;  %v3068_v48 = vld [vmem:[%s4276_s29] ss:$0 sm:$0xff]  ;;  %s2831_s29 = sshll.u32 %s3752_s26, 4  ;;  %s4163_s29 = int_to_ptr.vmem [resolvable:$true] %s2831_s29 }
 0x53a   : > { %v2252_v27 = vrot.slane %v2244_v49, %v3801_v24  ;;  %v2259_v28 = vrot.slane %v2245_v18, %v3801_v24  ;;  %2473 = vrot.lane.b32.xlu1 %v2462_v20, %s3540_s23  ;;  %2469 = vrot.lane.b32.xlu0 %v2461_v21, %s3541_s16  ;;  %v3250_v29 = vpop.f32.mrb[39].mxu0  ;;  %v3429_v18 = vld [vmem:[%s3752_s26] sm:$0xff]  ;;  %s3430_s30 = scalar_lea.vmem %s4163_s29, 128 }
 0x53b   : > { %v3386_v29 = vld [vmem:[%s3742_s24 + $0x8] sm:$0xff]   ;;  %p3431_p1 = scmp.ne.s32.totalorder %s4163_s29, %s3430_s30 }
 0x53c   : > { %v2292_v30 = vcombine.low %v2236_v22, %v2252_v27  ;;  %v2293_v7 = vcombine.high %v2236_v22, %v2252_v27  ;;  %v2308_v31 = vcombine.low %v2243_v26, %v2259_v28  ;;  %v2309_v11 = vcombine.high %v2243_v26, %v2259_v28  ;;  %v3383_v26 = vld [vmem:[%s3728_s15] sm:$0xff]   ;;  %v3384_v27 = vld [vmem:[%s3728_s15 + $0x8] sm:$0xff]  }
 0x53d   : > { %3260 = vmatpush3.bf16.msra.mxu0 %v3383_v26  ;;  %v3385_v28 = vld [vmem:[%s3742_s24] sm:$0xff]   ;;  %p3432_p2 = pnand %p3431_p1, %p3667_p3 }
 0x53e   : > { %v2300_v12 = vrot.slane %v2292_v30, %v3813_v41  ;;  %v2307_v13 = vrot.slane %v2293_v7, %v3813_v41  ;;  %v2316_v34 = vrot.slane %v2308_v31, %v3813_v41  ;;  %v2323_v17 = vrot.slane %v2309_v11, %v3813_v41  ;;  %2477 = vrot.lane.b32.xlu1 %v2463_v23, %s3542_s22  ;;  %v3387_v30 = vld [vmem:[%s3742_s24 + $0x10] sm:$0xff]   ;;  %v3388_v7 = vld [vmem:[%s3742_s24 + $0x18] sm:$0xff]   ;;  %v3389_v31 = vld [vmem:[%s3742_s24 + $0x20] sm:$0xff]  }
 0x53f   : > { %3261 = vmatprep.subr.bf16.mxu0 %v3526_v2  ;;  %v3390_v11 = vld [vmem:[%s3742_s24 + $0x28] sm:$0xff]   ;;  %p3433_p4 = pneg %p3432_p2 }
 0x540   : > { %v3061_v52 = vcombine.low %v2300_v12, %v2307_v13  ;;  %v3063_v14 = vcombine.high %v2300_v12, %v2307_v13  ;;  %v3065_v16 = vcombine.low %v2316_v34, %v2323_v17  ;;  %v3067_v35 = vcombine.high %v2316_v34, %v2323_v17  ;;  %v3072_v17 = vld [vmem:[%s4277_s17] ss:$0 sm:$0xff]  ;;  %s4283_s17 = sld [smem:[#allocation24_spill]] }
 0x541   : > { %3262 = vmatpush3.bf16.msra.mxu0 %v3384_v27 }
 0x542   : > { %v2347_v36 = vrot.slane %v3061_v52, %v3801_v24  ;;  %v2363_v37 = vrot.slane %v3063_v14, %v3801_v24  ;;  %v2379_v38 = vrot.slane %v3065_v16, %v3801_v24  ;;  %v2395_v40 = vrot.slane %v3067_v35, %v3801_v24  ;;  %v3073_v14 = vld [vmem:[%s4278_s19] ss:$0 sm:$0xff] }
 0x544   : > { %v2412_v42 = vcombine.low %v2347_v36, %v2363_v37  ;;  %v2444_v43 = vcombine.low %v2379_v38, %v2395_v40  ;;  %v2413_v46 = vcombine.high %v2347_v36, %v2363_v37  ;;  %v2445_v47 = vcombine.high %v2379_v38, %v2395_v40  ;;  %v3391_v36 = vld [vmem:[%s3742_s24 + $0x30] sm:$0xff]   ;;  %v3392_v37 = vld [vmem:[%s3742_s24 + $0x38] sm:$0xff]   ;;  %v3074_v38 = vld [vmem:[%s628_s13] ss:$0 sm:$0xff]  ;;  %s4279_s13 = sld [smem:[#allocation9_spill]] }
 0x546   : > { %v2420_v51 = vrot.slane %v2412_v42, %v3813_v41  ;;  %v2452_v53 = vrot.slane %v2444_v43, %v3813_v41  ;;  %v2427_v54 = vrot.slane %v2413_v46, %v3813_v41  ;;  %v2459_v15 = vrot.slane %v2445_v47, %v3813_v41 }
 0x548   : > { %v2465_v57 = vcombine.high %v2420_v51, %v2452_v53  ;;  %v2464_v58 = vcombine.low %v2420_v51, %v2452_v53  ;;  %v2467_v59 = vcombine.high %v2427_v54, %v2459_v15  ;;  %v2466_v60 = vcombine.low %v2427_v54, %v2459_v15 }
 0x54a   : > { %2485 = vrot.lane.b32.xlu1 %v2465_v57, %s3543_s12  ;;  %2481 = vrot.lane.b32.xlu0 %v2464_v58, %s3544_s21  ;;  %s3090_s2 = sshll.u32 %s4279_s13, 7 }
 0x54b   : > { %s4161_s28 = scalar_lea.hbm %s4283_s17, %s3090_s2 }
 0x54e   : > { %2493 = vrot.lane.b32.xlu1 %v2467_v59, %s3545_s25  ;;  %2489 = vrot.lane.b32.xlu0 %v2466_v60, %s3546_s20 }
 0x5ac   : > { %v2474_v24 = vpop.permute.xlu1 %2473  ;;  %v2470_v61 = vpop.permute.xlu0 %2469 }
 0x5ad   : > { %v2496_v63 = vsel %vm1361_vm3, %v2460_v25, %v2470_v61 }
 0x5ae   : > { %v2497_v41 = vsel %vm1730_vm4, %v2496_v63, %v2474_v24 }
 0x5b0   : > { %v2478_v39 = vpop.permute.xlu1 %2477 }
 0x5b1   : > { %v2499_v50 = vsel %vm2498_vm6, %v2497_v41, %v2478_v39 }
 0x5bc   : > { %v2486_v0 = vpop.permute.xlu1 %2485  ;;  %v2482_v1 = vpop.permute.xlu0 %2481 }
 0x5bd   : > { %v2501_v3 = vsel %vm2500_vm7, %v2499_v50, %v2482_v1 }
 0x5be   : > { %v2503_v56 = vsel %vm2502_vm8, %v2501_v3, %v2486_v0 }
 0x5c0   : > { %v2494_v4 = vpop.permute.xlu1 %2493  ;;  %v2490_v5 = vpop.permute.xlu0 %2489 }
 0x5c1   : > { %v2505_v55 = vsel %vm2504_vm9, %v2503_v56, %v2490_v5  ;;  %v3087_v56 = vld [vmem:[%s639_s1] ss:$0 sm:$0xff] }
 0x5c2   : > { %v2507_v8 = vsel %vm2506_vm10, %v2505_v55, %v2494_v4  ;;  %v3088_v55 = vld [vmem:[%s642_s7] ss:$0 sm:$0xff]  ;;  %s3547_s7 = smov [#allocation2]  }
 0x5c3   : > { %v2508_v44 = vpack.c.bf16 %v2507_v8, %v2507_v8  ;;  %s3434_s19 = sshll.u32 %s3547_s7, 4  ;;  %s3435_s19 = int_to_ptr.vmem [resolvable:$false] %s3434_s19 }
 0x5c4   : > { %s3436_s27 = scalar_lea.vmem %s3435_s19, 256  ;;  %p3437_p5 = scmp.lt.s32.totalorder %s4163_s29, %s3435_s19 }
 0x5c5   : > { %3256 = vmatmul.mubr.msk.bf16.vlgmr.msra.gmra.mrb[28].mxu1 %vm669_vm2, %v2508_v44  ;;  %p3438_p6 = scmp.lt.s32.totalorder %s3436_s27, %s3430_s30 }
 0x5c6   : > { %3283 = vmatprep.mubr.msk.bf16.mxu1 %vm3527_vm1, %v3526_v2  ;;  %3268 = vmatpush3.bf16.msra.mxu1 %v3385_v28 }
 0x5c7   : > { %3269 = vmatprep.subr.bf16.mxu1 %v3526_v2  ;;  %p3439_p7 = por %p3438_p6, %p3437_p5 }
 0x5c9   : > { %p3440_p8 = pnand %p3439_p7, %p3433_p4 }
 0x5ca   : > { %3270 = vmatpush3.bf16.msra.mxu1 %v3386_v29 }
 0x5cb   : > { %3271 = vmatprep.subr.bf16.mxu1 %v3526_v2 }
 0x5ce   : > { %3272 = vmatpush3.bf16.msra.mxu1 %v3387_v30 }
 0x5cf   : > { %3273 = vmatprep.subr.bf16.mxu1 %v3526_v2 }
 0x5d2   : > { %3274 = vmatpush3.bf16.msra.mxu1 %v3388_v7 }
 0x5d3   : > { %3275 = vmatprep.subr.bf16.mxu1 %v3526_v2 }
 0x5d6   : > { %3276 = vmatpush3.bf16.msra.mxu1 %v3389_v31 }
 0x5d7   : > { %3277 = vmatprep.subr.bf16.mxu1 %v3526_v2 }
 0x5da   : > { %3278 = vmatpush3.bf16.msra.mxu1 %v3390_v11 }
 0x5db   : > { %3279 = vmatprep.subr.bf16.mxu1 %v3526_v2 }
 0x5de   : > { %3280 = vmatpush3.bf16.msra.mxu1 %v3391_v36 }
 0x5df   : > { %3281 = vmatprep.subr.bf16.mxu1 %v3526_v2  ;;  %v3078_v2 = vld [vmem:[%s636_s3] ss:$0 sm:$0xff]  ;;  %s4280_s3 = sld [smem:[#allocation6_spill]] }
 0x5e2   : > { %3282 = vmatpush3.bf16.msra.mxu1 %v3392_v37 }
 0x5e5   : > { %s4284_s1 = sand.u32 1, %s4280_s3  }
 0x5e6   : > { %s2818_s18 = scalar_lea.sflag [#allocation3], %s4284_s1 }
 0x698   : > { %v2569_v6 = vpop.f32.mrb[28].mxu1 }
 0x699   : > { %v2570_v62 = vadd.f32 %v3068_v48, %v2569_v6  ;;  %v3257_v9 = vpop.f32.mrb[29].mxu1 }
 0x69a   : > { %v2572_v45 = vpop.f32.mrb[30].mxu1 }
 0x69b   : > { %v3258_v49 = vpop.f32.mrb[31].mxu1  ;;  %v2575_v19 = vadd.f32 %v3429_v18, %v2570_v62 }
 0x69d   : > { %v2578_v20 = vsel %vm669_vm2, %v2575_v19, 0.0 }
 0x69e   : > { %2579 = vadd.xlane.f32.xlu0 %v2578_v20 }
 0x72b   : > { %v2580_v21 = vpop.xlane.xlu0 %2579 }
 0x72c   : > { %v2582_v22 = vmul.f32 0.03125, %v2580_v21 }
 0x72e   : > { %v2583_v10 = vsub.f32 %v2575_v19, %v2582_v22 }
 0x730   : > { %v2584_v23 = vmul.f32 %v2583_v10, %v2583_v10 }
 0x732   : > { %v2585_v25 = vsel %vm669_vm2, %v2584_v23, 0.0 }
 0x733   : > { %2586 = vadd.xlane.f32.xlu1 %v2585_v25 }
 0x7c0   : > { %v2587_v32 = vpop.xlane.xlu1 %2586 }
 0x7c1   : > { %v2588_v12 = vmul.f32 0.03125, %v2587_v32 }
 0x7c3   : > { %v2589_v13 = vadd.f32 1e-05, %v2588_v12 }
 0x7c5   : > { %3425 = vrsqrt.f32 %v2589_v13 }
 0x7cf   : > { %v3426_v34 = vpop.eup %3425 }
 0x7d0   : > { %v2591_v52 = vmul.f32 %v3426_v34, %v2583_v10 }
 0x7d2   : > { %v2598_v16 = vmul.f32 %v3072_v17, %v2591_v52 }
 0x7d4   : > { %v2605_v35 = vadd.f32 %v3073_v14, %v2598_v16 }
 0x7d6   : > { %v2606_v33 = vpack.c.bf16 %v2605_v35, %v2605_v35 }
 0x7d8   : > { %3264 = vmatmul.mubr.msk.bf16.vlgmr.msra.gmra.mrb[40].mxu0 %vm669_vm2, %v2606_v33 }
 0x8ab   : > { %v2667_v40 = vpop.f32.mrb[40].mxu0 }
 0x8ac   : > { %v2668_v42 = vadd.f32 %v3074_v38, %v2667_v40  ;;  %v3265_v43 = vpop.f32.mrb[41].mxu0 }
 0x8ad   : > { %v2670_v46 = vpop.f32.mrb[42].mxu0 }
 0x8ae   : > { %v2673_v47 = vmax.f32 %v2668_v42, 0.0  ;;  %v3266_v51 = vpop.f32.mrb[43].mxu0 }
 0x8b0   : > { %v2674_v53 = vpack.c.bf16 %v2673_v47, %v2673_v47 }
 0x8b2   : > { %3284 = vmatmul.mubr.bf16.vlgmr.msra.gmra.mrb[32].mxu1 %v2674_v53 }
 0x985   : > { %v2780_v54 = vpop.f32.mrb[32].mxu1 }
 0x986   : > { %v2781_v15 = vadd.f32 %v3078_v2, %v2780_v54  ;;  %v3285_v57 = vpop.f32.mrb[33].mxu1 }
 0x987   : > { %v2783_v58 = vpop.f32.mrb[34].mxu1 }
 0x988   : > { %v3286_v59 = vpop.f32.mrb[35].mxu1  ;;  %v2786_v60 = vadd.f32 %v2781_v15, %v2605_v35 }
 0x98a   : > { %v2789_v24 = vsel %vm669_vm2, %v2786_v60, 0.0 }
 0x98b   : > { %2790 = vadd.xlane.f32.xlu0 %v2789_v24 }
 0xa18   : > { %v2791_v61 = vpop.xlane.xlu0 %2790 }
 0xa19   : > { %v2792_v63 = vmul.f32 0.03125, %v2791_v61 }
 0xa1b   : > { %v2793_v39 = vsub.f32 %v2786_v60, %v2792_v63 }
 0xa1d   : > { %v2794_v41 = vmul.f32 %v2793_v39, %v2793_v39 }
 0xa1f   : > { %v2795_v50 = vsel %vm669_vm2, %v2794_v41, 0.0 }
 0xa20   : > { %2796 = vadd.xlane.f32.xlu0 %v2795_v50 }
 0xaad   : > { %v2797_v0 = vpop.xlane.xlu0 %2796 }
 0xaae   : > { %v2798_v1 = vmul.f32 0.03125, %v2797_v0 }
 0xab0   : > { %v2799_v3 = vadd.f32 1e-05, %v2798_v1 }
 0xab2   : > { %3427 = vrsqrt.f32 %v2799_v3 }
 0xabc   : > { %v3428_v4 = vpop.eup %3427 }
 0xabd   : > { %v2801_v5 = vmul.f32 %v3428_v4, %v2793_v39 }
 0xabf   : > { %v2808_v8 = vmul.f32 %v3087_v56, %v2801_v5 }
 0xac1   : > { %v2815_v44 = vadd.f32 %v3088_v55, %v2808_v8 }
 0xac3   : > { %2816 = vst.msk [vmem:[%s3752_s26] sm:$0xff] %vm669_vm2, %v2815_v44 }
 0xac4   : > { %3443 = shalt.err (!%p3440_p8)
}
 0xac5   : > { %s3444_s26 = scalar_lea.hbm %s4161_s28, 128  ;;  %s3448_s22 = scalar_lea.hbm %s4283_s17, 256 }
 0xac6   : > { %p3445_p10 = scmp.ne.s32.totalorder %s4161_s28, %s3444_s26  ;;  %p3449_p13 = scmp.lt.u32.totalorder %s4161_s28, %s4283_s17 }
 0xac7   : > { %p3450_p0 = scmp.lt.u32.totalorder %s3448_s22, %s3444_s26  ;;  %p3452_p2 = scmp.lt.u32.totalorder %s3444_s26, %s4161_s28 }
 0xac8   : > { %p3446_p11 = pnand %p3445_p10, %p3667_p3 }
 0xac9   : > { %p3451_p1 = por %p3450_p0, %p3449_p13 }
 0xaca   : > { %p3447_p12 = pneg %p3446_p11 }
 0xacb   : > { %p3453_p4 = por %p3452_p2, %p3451_p1 }
 0xacd   : > { %p3454_p5 = pnand %p3453_p4, %p3447_p12 }
 0xacf   : > { %3457 = shalt.err (!%p3454_p5)
}
 0xad0   : > { %3287 = dma.vmem_to_hbm [thread:$0]  (%p3667_p3), %s4163_s29, 128, %s4161_s28, %s2818_s18  }
 0xad1 PF: > { %s4285_s12 = sld [smem:[#allocation12_spill]]  ;;  %s4286_s21 = sld [smem:[#allocation5_spill]] }
 0xad7   : > { %p3293_p6 = scmp.ge.s32.totalorder %s4285_s12, 2  ;;  %s2843_s20 = sand.u32 1, %s4286_s21  }
 0xad8   : > { %s2844_s0 = scalar_lea.sflag [#allocation3], %s2843_s20 }
 0xad9   : > { %p3290_p7 = pnand %p3293_p6, %p3677_p9 }
 0xadb   : > { %3491 = dma.done.wait (!%p3290_p7), %s2844_s0, 128  }
 0xadc   : > { %3493 = vsyncadd (!%p3290_p7), %s2844_s0, 4294967168  ;;  %s26_s15 = sadd.s32 1, %s4285_s12   ;;  %s4288_s25 = sld [smem:[#allocation6_spill]] }
 0xadd   : > { %p23_p8 = scmp.ge.s32.totalorder %s26_s15, 6   ;;  %s4289_s26 = sld [smem:[#allocation7_spill]] }
 0xade   : > { %s4290_s27 = sld [smem:[#allocation17_spill]]  ;;  %s4291_s28 = sld [smem:[#allocation10_spill]] }
 0xadf   : > { %s4292_s29 = sld [smem:[#allocation11_spill]]  ;;  %s4293_s30 = sld [smem:[#allocation13_spill]] }
 0xae0   : > { %s4294_s14 = sld [smem:[#allocation15_spill]]  ;;  %25 = sbr.rel (!%p23_p8) target bundleno = 13 (0xd), region = 147 }
 0xae7   :  { %2849 = vsyncpa [#allocation3], 1 }
 0xae8   :  { %2851 = vsyncpa [#allocation3 + $0x1], 1 }

</bundles_post_ra>
